<compile_context>
chip_gen: v7x
topology: tpu7x:2x2x1
jax: 0.10.0
libtpu: 0.0.40
codegen_flags: <defaults>
</compile_context>

<pallas_src>
import jax
import jax.numpy as jnp
from jax.experimental import pallas as pl
from jax.experimental.pallas import tpu as pltpu


def _round_up(x, m):
    return (x + m - 1) // m * m


def _fuse_sft_kernel(
    # scalar (SMEM)
    w_ref,
    # row-tiled activations
    enc_ref, dec_ref,
    # ResnetBlockFC params (fc_0 split, fc_1, shortcut split) — weights bf16, biases f32
    w0e_ref, w0d_ref, b0_ref, w1_ref, b1_ref, wse_ref, wsd_ref,
    # fused first layer of scale/shift branches + their second layers
    wab1_ref, bab1_ref, wa2_ref, ba2_ref, wb2_ref, bb2_ref,
    # output
    out_ref,
):
    out_ch = out_ref.shape[-1]
    w = w_ref[0, 0]

    enc_bf = enc_ref[...]                               # bf16, lane-padded K
    dec_f32 = dec_ref[...].astype(jnp.float32)          # f32 for the residual path
    dec_bf = dec_ref[...].astype(jnp.bfloat16)          # bf16 only at the MXU

    relu = lambda t: jnp.maximum(t, jnp.zeros_like(t))
    lrelu = lambda t: jnp.where(t > 0, t, 0.2 * t)      # LeakyReLU(0.2), f32 VPU
    dot = lambda a, b: jnp.dot(a, b, preferred_element_type=jnp.float32)

    # ---- ResnetBlockFC(concat(enc, dec)), concat folded into split weights ----
    net = (dot(relu(enc_bf), w0e_ref[...])
           + dot(relu(dec_bf), w0d_ref[...])
           + b0_ref[...])                               # f32
    dx = dot(relu(net).astype(jnp.bfloat16), w1_ref[...]) + b1_ref[...]
    x_s = dot(enc_bf, wse_ref[...]) + dot(dec_bf, wsd_ref[...])
    feat = x_s + dx                                     # f32

    # ---- scale & shift first layers fused: one [tm, C] x [C, 2C] matmul ----
    hg = lrelu(dot(feat.astype(jnp.bfloat16), wab1_ref[...]) + bab1_ref[...])
    h = hg[:, :out_ch].astype(jnp.bfloat16)
    g = hg[:, out_ch:].astype(jnp.bfloat16)

    scale = dot(h, wa2_ref[...]) + ba2_ref[...]
    shift = dot(g, wb2_ref[...]) + bb2_ref[...]

    # ---- residual: out = dec + w * (dec * scale + shift), all f32 ----
    out = dec_f32 + w * (dec_f32 * scale + shift)
    out_ref[...] = out.astype(out_ref.dtype)


def fuse_sft_mlp(enc_feat, dec_feat, params, w=1.0, *, tile_m=256):
    """enc_feat: [B, S, in_ch], dec_feat: [B, S, out_ch] -> [B, S, out_ch]."""
    B, S, in_ch = enc_feat.shape
    out_ch = dec_feat.shape[-1]
    N = B * S

    # MXU-sized row tiles; pad N up instead of requiring divisibility.
    tm = min(tile_m, _round_up(N, 8))
    n_pad = _round_up(N, tm)

    # Lane-align the enc feature dim (K of two matmuls), e.g. 257 -> 384.
    k_pad = _round_up(in_ch, 128)

    enc2d = enc_feat.reshape(N, in_ch).astype(jnp.bfloat16)
    dec2d = dec_feat.reshape(N, out_ch)
    enc2d = jnp.pad(enc2d, ((0, n_pad - N), (0, k_pad - in_ch)))
    dec2d = jnp.pad(dec2d, ((0, n_pad - N), (0, 0)))

    bf16 = lambda a: a.astype(jnp.bfloat16)
    frow = lambda a: a.astype(jnp.float32).reshape(1, -1)

    # Split concat-facing weights into enc/dec halves; zero-pad the enc K dim.
    W0e = jnp.pad(params["W0"][:in_ch], ((0, k_pad - in_ch), (0, 0)))
    W0d = params["W0"][in_ch:]
    Wse = jnp.pad(params["Ws"][:in_ch], ((0, k_pad - in_ch), (0, 0)))
    Wsd = params["Ws"][in_ch:]

    # Fuse the first layers of the scale/shift branches into one [C, 2C] matmul.
    Wab1 = jnp.concatenate([params["Wa1"], params["Wb1"]], axis=1)
    bab1 = jnp.concatenate([params["ba1"], params["bb1"]], axis=0)

    weights = [
        bf16(W0e), bf16(W0d), frow(params["b0"]),
        bf16(params["W1"]), frow(params["b1"]),
        bf16(Wse), bf16(Wsd),
        bf16(Wab1), frow(bab1),
        bf16(params["Wa2"]), frow(params["ba2"]),
        bf16(params["Wb2"]), frow(params["bb2"]),
    ]

    w_arr = jnp.asarray(w, jnp.float32).reshape(1, 1)

    def _call(single_buffer_weights):
        if single_buffer_weights:
            # Constant-index weight blocks are never re-fetched; single-buffer them
            # to free VMEM headroom (matters most on v7x's 64 MiB VMEM).
            const_spec = lambda a: pl.BlockSpec(a.shape, lambda i: (0, 0),
                                                pipeline_mode=pl.Buffered(1))
        else:
            const_spec = lambda a: pl.BlockSpec(a.shape, lambda i: (0, 0))

        grid_spec = pltpu.PrefetchScalarGridSpec(
            num_scalar_prefetch=0,
            grid=(n_pad // tm,),
            in_specs=[pl.BlockSpec(memory_space=pltpu.MemorySpace.SMEM),  # w scalar
                      pl.BlockSpec((tm, k_pad), lambda i: (i, 0)),        # enc rows
                      pl.BlockSpec((tm, out_ch), lambda i: (i, 0))]       # dec rows
                     + [const_spec(a) for a in weights],
            out_specs=pl.BlockSpec((tm, out_ch), lambda i: (i, 0)),
        )
        return pl.pallas_call(
            _fuse_sft_kernel,
            out_shape=jax.ShapeDtypeStruct((n_pad, out_ch), dec_feat.dtype),
            grid_spec=grid_spec,
            compiler_params=pltpu.CompilerParams(
                dimension_semantics=("parallel",),   # row tiles shard across TCs on v7x
                vmem_limit_bytes=32 * 1024 * 1024,
            ),
        )(w_arr, enc2d, dec2d, *weights)

    try:
        out2d = _call(single_buffer_weights=True)
    except Exception:
        # Fallback if this jax build rejects pipeline_mode=pl.Buffered(1);
        # weights are still only DMA'd once (constant index_map), just double-allocated.
        out2d = _call(single_buffer_weights=False)

    return out2d[:N].reshape(B, S, out_ch)


def init_params(key, in_ch, out_ch):
    size_in = in_ch + out_ch
    size_h = min(size_in, out_ch)
    ks = jax.random.split(key, 13)
    n = lambda k, shp: jax.random.normal(k, shp, jnp.float32) * 0.1
    # NOTE: PyTorch's ResnetBlockFC zero-inits fc_1.weight; random weights here so the
    # full compute path is exercised (forward semantics unchanged).
    return {
        "W0": n(ks[0], (size_in, size_h)), "b0": n(ks[1], (size_h,)),
        "W1": n(ks[2], (size_h, out_ch)), "b1": n(ks[3], (out_ch,)),
        "Ws": n(ks[4], (size_in, out_ch)),                      # shortcut, no bias
        "Wa1": n(ks[5], (out_ch, out_ch)), "ba1": n(ks[6], (out_ch,)),
        "Wa2": n(ks[7], (out_ch, out_ch)), "ba2": n(ks[8], (out_ch,)),
        "Wb1": n(ks[9], (out_ch, out_ch)), "bb1": n(ks[10], (out_ch,)),
        "Wb2": n(ks[11], (out_ch, out_ch)), "bb2": n(ks[12], (out_ch,)),
    }


def ref_forward_f32(enc, dec, p, w=1.0):
    relu = lambda t: jnp.maximum(t, 0.0)
    lrelu = lambda t: jnp.where(t > 0, t, 0.2 * t)
    x = jnp.concatenate([enc, dec], axis=-1)
    net = relu(x) @ p["W0"] + p["b0"]
    dx = relu(net) @ p["W1"] + p["b1"]
    feat = x @ p["Ws"] + dx
    scale = lrelu(feat @ p["Wa1"] + p["ba1"]) @ p["Wa2"] + p["ba2"]
    shift = lrelu(feat @ p["Wb1"] + p["bb1"]) @ p["Wb2"] + p["bb2"]
    return dec + w * (dec * scale + shift)


def ref_forward_bf16(enc, dec, p, w=1.0):
    """Mirrors the kernel's numerics: bf16 at every matmul input, f32 accumulation."""
    bf = lambda t: t.astype(jnp.bfloat16)
    dot = lambda a, b: jnp.dot(bf(a), bf(b), preferred_element_type=jnp.float32)
    relu = lambda t: jnp.maximum(t, 0.0)
    lrelu = lambda t: jnp.where(t > 0, t, 0.2 * t)
    x = jnp.concatenate([enc, dec], axis=-1)
    net = dot(relu(x), p["W0"]) + p["b0"]
    dx = dot(relu(net), p["W1"]) + p["b1"]
    feat = dot(x, p["Ws"]) + dx
    scale = dot(lrelu(dot(feat, p["Wa1"]) + p["ba1"]), p["Wa2"]) + p["ba2"]
    shift = dot(lrelu(dot(feat, p["Wb1"]) + p["bb1"]), p["Wb2"]) + p["bb2"]
    return dec + w * (dec * scale + shift)


if __name__ == "__main__":
    # Small analog of the real config (in_ch=256+1, out_ch=256): in_ch=9, out_ch=128.
    # out_ch is kept >= 128 so the output tile is lane-dense (no masked partial stores);
    # in_ch=9 exercises the lane-padding path (9 -> 128), like 257 -> 384 in production.
    B, S = 2, 8
    in_ch, out_ch = 9, 128

    key = jax.random.PRNGKey(0)
    k_enc, k_dec, k_par = jax.random.split(key, 3)
    enc_feat = jax.random.normal(k_enc, (B, S, in_ch), jnp.float32)
    dec_feat = jax.random.normal(k_dec, (B, S, out_ch), jnp.float32)
    params = init_params(k_par, in_ch, out_ch)

    out = fuse_sft_mlp(enc_feat, dec_feat, params, w=1.0)
    out = jax.block_until_ready(out)
    assert out.shape == (B, S, out_ch)

    # Tight check vs a reference mirroring the kernel's bf16-MXU / f32-accumulate path.
    ref_bf = ref_forward_bf16(enc_feat, dec_feat, params, w=1.0)
    assert jnp.allclose(out, ref_bf, atol=1e-2, rtol=1e-2), "mismatch vs bf16-mirrored reference"

    # Loose semantics check vs the pure-f32 reference (bf16 matmul inputs => ~1% error).
    ref_f32 = ref_forward_f32(enc_feat, dec_feat, params, w=1.0)
    assert jnp.allclose(out, ref_f32, atol=1e-1, rtol=1e-1), "mismatch vs f32 reference"

    print("KERNEL_OK")
</pallas_src>

<mosaic_0001>
module attributes {stable_mosaic.version = 11 : i64} {
  func.func @_fuse_sft_kernel(%arg0: i32, %arg1: memref<1x1xf32, #tpu.memory_space<smem>>, %arg2: memref<16x128xbf16, #tpu.memory_space<vmem>>, %arg3: memref<16x128xf32, #tpu.memory_space<vmem>>, %arg4: memref<128x128xbf16, #tpu.memory_space<vmem>>, %arg5: memref<128x128xbf16, #tpu.memory_space<vmem>>, %arg6: memref<1x128xf32, #tpu.memory_space<vmem>>, %arg7: memref<128x128xbf16, #tpu.memory_space<vmem>>, %arg8: memref<1x128xf32, #tpu.memory_space<vmem>>, %arg9: memref<128x128xbf16, #tpu.memory_space<vmem>>, %arg10: memref<128x128xbf16, #tpu.memory_space<vmem>>, %arg11: memref<128x256xbf16, #tpu.memory_space<vmem>>, %arg12: memref<1x256xf32, #tpu.memory_space<vmem>>, %arg13: memref<128x128xbf16, #tpu.memory_space<vmem>>, %arg14: memref<1x128xf32, #tpu.memory_space<vmem>>, %arg15: memref<128x128xbf16, #tpu.memory_space<vmem>>, %arg16: memref<1x128xf32, #tpu.memory_space<vmem>>, %arg17: memref<16x128xf32, #tpu.memory_space<vmem>>) attributes {dimension_semantics = [#tpu.dimension_semantics<parallel>], iteration_bounds = array<i64: 1>, scalar_prefetch = 0 : i64, scratch_operands = 0 : i64, tpu.core_type = #tpu.core_type<tc>, window_params = [{transform_indices = @transform_0, window_bounds = array<i64: 1, 1>}, {transform_indices = @transform_1, window_bounds = array<i64: 16, 128>}, {transform_indices = @transform_2, window_bounds = array<i64: 16, 128>}, {pipeline_mode = #tpu.pipeline_mode<synchronous>, transform_indices = @transform_3, window_bounds = array<i64: 128, 128>}, {pipeline_mode = #tpu.pipeline_mode<synchronous>, transform_indices = @transform_4, window_bounds = array<i64: 128, 128>}, {pipeline_mode = #tpu.pipeline_mode<synchronous>, transform_indices = @transform_5, window_bounds = array<i64: 1, 128>}, {pipeline_mode = #tpu.pipeline_mode<synchronous>, transform_indices = @transform_6, window_bounds = array<i64: 128, 128>}, {pipeline_mode = #tpu.pipeline_mode<synchronous>, transform_indices = @transform_7, window_bounds = array<i64: 1, 128>}, {pipeline_mode = #tpu.pipeline_mode<synchronous>, transform_indices = @transform_8, window_bounds = array<i64: 128, 128>}, {pipeline_mode = #tpu.pipeline_mode<synchronous>, transform_indices = @transform_9, window_bounds = array<i64: 128, 128>}, {pipeline_mode = #tpu.pipeline_mode<synchronous>, transform_indices = @transform_10, window_bounds = array<i64: 128, 256>}, {pipeline_mode = #tpu.pipeline_mode<synchronous>, transform_indices = @transform_11, window_bounds = array<i64: 1, 256>}, {pipeline_mode = #tpu.pipeline_mode<synchronous>, transform_indices = @transform_12, window_bounds = array<i64: 128, 128>}, {pipeline_mode = #tpu.pipeline_mode<synchronous>, transform_indices = @transform_13, window_bounds = array<i64: 1, 128>}, {pipeline_mode = #tpu.pipeline_mode<synchronous>, transform_indices = @transform_14, window_bounds = array<i64: 128, 128>}, {pipeline_mode = #tpu.pipeline_mode<synchronous>, transform_indices = @transform_15, window_bounds = array<i64: 1, 128>}, {transform_indices = @transform_16, window_bounds = array<i64: 16, 128>}]} {
    %c0 = arith.constant 0 : index
    %c0_0 = arith.constant 0 : index
    %0 = memref.load %arg1[%c0, %c0_0] : memref<1x1xf32, #tpu.memory_space<smem>>
    %c0_1 = arith.constant 0 : index
    %c0_2 = arith.constant 0 : index
    %1 = vector.load %arg2[%c0_1, %c0_2] : memref<16x128xbf16, #tpu.memory_space<vmem>>, vector<16x128xbf16>
    %c0_3 = arith.constant 0 : index
    %c0_4 = arith.constant 0 : index
    %2 = vector.load %arg3[%c0_3, %c0_4] : memref<16x128xf32, #tpu.memory_space<vmem>>, vector<16x128xf32>
    %c0_5 = arith.constant 0 : index
    %c0_6 = arith.constant 0 : index
    %3 = vector.load %arg3[%c0_5, %c0_6] : memref<16x128xf32, #tpu.memory_space<vmem>>, vector<16x128xf32>
    %4 = arith.truncf %3 : vector<16x128xf32> to vector<16x128xbf16>
    %cst = arith.constant 0.000000e+00 : bf16
    %5 = vector.broadcast %cst : bf16 to vector<16x128xbf16>
    %6 = arith.maximumf %1, %5 : vector<16x128xbf16>
    %c0_7 = arith.constant 0 : index
    %c0_8 = arith.constant 0 : index
    %7 = vector.load %arg4[%c0_7, %c0_8] : memref<128x128xbf16, #tpu.memory_space<vmem>>, vector<128x128xbf16>
    %cst_9 = arith.constant dense<0.000000e+00> : vector<16x128xf32>
    %8 = tpu.matmul %6, %7, %cst_9 {dimension_numbers = #tpu.dot_dimension_numbers<[1], [0], [0], [1], [0, 0, 1, 1], [], []>} : vector<16x128xbf16>, vector<128x128xbf16>, vector<16x128xf32> -> vector<16x128xf32>
    %cst_10 = arith.constant 0.000000e+00 : bf16
    %9 = vector.broadcast %cst_10 : bf16 to vector<16x128xbf16>
    %10 = arith.maximumf %4, %9 : vector<16x128xbf16>
    %c0_11 = arith.constant 0 : index
    %c0_12 = arith.constant 0 : index
    %11 = vector.load %arg5[%c0_11, %c0_12] : memref<128x128xbf16, #tpu.memory_space<vmem>>, vector<128x128xbf16>
    %cst_13 = arith.constant dense<0.000000e+00> : vector<16x128xf32>
    %12 = tpu.matmul %10, %11, %cst_13 {dimension_numbers = #tpu.dot_dimension_numbers<[1], [0], [0], [1], [0, 0, 1, 1], [], []>} : vector<16x128xbf16>, vector<128x128xbf16>, vector<16x128xf32> -> vector<16x128xf32>
    %13 = arith.addf %8, %12 : vector<16x128xf32>
    %c0_14 = arith.constant 0 : index
    %c0_15 = arith.constant 0 : index
    %14 = vector.load %arg6[%c0_14, %c0_15] : memref<1x128xf32, #tpu.memory_space<vmem>>, vector<1x128xf32>
    %15 = vector.broadcast %14 : vector<1x128xf32> to vector<16x128xf32>
    %16 = arith.addf %13, %15 : vector<16x128xf32>
    %cst_16 = arith.constant 0.000000e+00 : f32
    %17 = vector.broadcast %cst_16 : f32 to vector<16x128xf32>
    %18 = arith.maximumf %16, %17 : vector<16x128xf32>
    %19 = arith.truncf %18 : vector<16x128xf32> to vector<16x128xbf16>
    %c0_17 = arith.constant 0 : index
    %c0_18 = arith.constant 0 : index
    %20 = vector.load %arg7[%c0_17, %c0_18] : memref<128x128xbf16, #tpu.memory_space<vmem>>, vector<128x128xbf16>
    %cst_19 = arith.constant dense<0.000000e+00> : vector<16x128xf32>
    %21 = tpu.matmul %19, %20, %cst_19 {dimension_numbers = #tpu.dot_dimension_numbers<[1], [0], [0], [1], [0, 0, 1, 1], [], []>} : vector<16x128xbf16>, vector<128x128xbf16>, vector<16x128xf32> -> vector<16x128xf32>
    %c0_20 = arith.constant 0 : index
    %c0_21 = arith.constant 0 : index
    %22 = vector.load %arg8[%c0_20, %c0_21] : memref<1x128xf32, #tpu.memory_space<vmem>>, vector<1x128xf32>
    %23 = vector.broadcast %22 : vector<1x128xf32> to vector<16x128xf32>
    %24 = arith.addf %21, %23 : vector<16x128xf32>
    %c0_22 = arith.constant 0 : index
    %c0_23 = arith.constant 0 : index
    %25 = vector.load %arg9[%c0_22, %c0_23] : memref<128x128xbf16, #tpu.memory_space<vmem>>, vector<128x128xbf16>
    %cst_24 = arith.constant dense<0.000000e+00> : vector<16x128xf32>
    %26 = tpu.matmul %1, %25, %cst_24 {dimension_numbers = #tpu.dot_dimension_numbers<[1], [0], [0], [1], [0, 0, 1, 1], [], []>} : vector<16x128xbf16>, vector<128x128xbf16>, vector<16x128xf32> -> vector<16x128xf32>
    %c0_25 = arith.constant 0 : index
    %c0_26 = arith.constant 0 : index
    %27 = vector.load %arg10[%c0_25, %c0_26] : memref<128x128xbf16, #tpu.memory_space<vmem>>, vector<128x128xbf16>
    %cst_27 = arith.constant dense<0.000000e+00> : vector<16x128xf32>
    %28 = tpu.matmul %4, %27, %cst_27 {dimension_numbers = #tpu.dot_dimension_numbers<[1], [0], [0], [1], [0, 0, 1, 1], [], []>} : vector<16x128xbf16>, vector<128x128xbf16>, vector<16x128xf32> -> vector<16x128xf32>
    %29 = arith.addf %26, %28 : vector<16x128xf32>
    %30 = arith.addf %29, %24 : vector<16x128xf32>
    %31 = arith.truncf %30 : vector<16x128xf32> to vector<16x128xbf16>
    %c0_28 = arith.constant 0 : index
    %c0_29 = arith.constant 0 : index
    %32 = vector.load %arg11[%c0_28, %c0_29] : memref<128x256xbf16, #tpu.memory_space<vmem>>, vector<128x256xbf16>
    %cst_30 = arith.constant dense<0.000000e+00> : vector<16x256xf32>
    %33 = tpu.matmul %31, %32, %cst_30 {dimension_numbers = #tpu.dot_dimension_numbers<[1], [0], [0], [1], [0, 0, 1, 1], [], []>} : vector<16x128xbf16>, vector<128x256xbf16>, vector<16x256xf32> -> vector<16x256xf32>
    %c0_31 = arith.constant 0 : index
    %c0_32 = arith.constant 0 : index
    %34 = vector.load %arg12[%c0_31, %c0_32] : memref<1x256xf32, #tpu.memory_space<vmem>>, vector<1x256xf32>
    %35 = vector.broadcast %34 : vector<1x256xf32> to vector<16x256xf32>
    %36 = arith.addf %33, %35 : vector<16x256xf32>
    %cst_33 = arith.constant 0.000000e+00 : f32
    %37 = vector.broadcast %cst_33 : f32 to vector<16x256xf32>
    %38 = arith.cmpf ogt, %36, %37 : vector<16x256xf32>
    %cst_34 = arith.constant 2.000000e-01 : f32
    %39 = vector.broadcast %cst_34 : f32 to vector<16x256xf32>
    %40 = arith.mulf %39, %36 : vector<16x256xf32>
    %41 = arith.select %38, %36, %40 : vector<16x256xi1>, vector<16x256xf32>
    %42 = vector.extract_strided_slice %41 {offsets = [0, 0], sizes = [16, 128], strides = [1, 1]} : vector<16x256xf32> to vector<16x128xf32>
    %43 = arith.truncf %42 : vector<16x128xf32> to vector<16x128xbf16>
    %44 = vector.extract_strided_slice %41 {offsets = [0, 128], sizes = [16, 128], strides = [1, 1]} : vector<16x256xf32> to vector<16x128xf32>
    %45 = arith.truncf %44 : vector<16x128xf32> to vector<16x128xbf16>
    %c0_35 = arith.constant 0 : index
    %c0_36 = arith.constant 0 : index
    %46 = vector.load %arg13[%c0_35, %c0_36] : memref<128x128xbf16, #tpu.memory_space<vmem>>, vector<128x128xbf16>
    %cst_37 = arith.constant dense<0.000000e+00> : vector<16x128xf32>
    %47 = tpu.matmul %43, %46, %cst_37 {dimension_numbers = #tpu.dot_dimension_numbers<[1], [0], [0], [1], [0, 0, 1, 1], [], []>} : vector<16x128xbf16>, vector<128x128xbf16>, vector<16x128xf32> -> vector<16x128xf32>
    %c0_38 = arith.constant 0 : index
    %c0_39 = arith.constant 0 : index
    %48 = vector.load %arg14[%c0_38, %c0_39] : memref<1x128xf32, #tpu.memory_space<vmem>>, vector<1x128xf32>
    %49 = vector.broadcast %48 : vector<1x128xf32> to vector<16x128xf32>
    %50 = arith.addf %47, %49 : vector<16x128xf32>
    %c0_40 = arith.constant 0 : index
    %c0_41 = arith.constant 0 : index
    %51 = vector.load %arg15[%c0_40, %c0_41] : memref<128x128xbf16, #tpu.memory_space<vmem>>, vector<128x128xbf16>
    %cst_42 = arith.constant dense<0.000000e+00> : vector<16x128xf32>
    %52 = tpu.matmul %45, %51, %cst_42 {dimension_numbers = #tpu.dot_dimension_numbers<[1], [0], [0], [1], [0, 0, 1, 1], [], []>} : vector<16x128xbf16>, vector<128x128xbf16>, vector<16x128xf32> -> vector<16x128xf32>
    %c0_43 = arith.constant 0 : index
    %c0_44 = arith.constant 0 : index
    %53 = vector.load %arg16[%c0_43, %c0_44] : memref<1x128xf32, #tpu.memory_space<vmem>>, vector<1x128xf32>
    %54 = vector.broadcast %53 : vector<1x128xf32> to vector<16x128xf32>
    %55 = arith.addf %52, %54 : vector<16x128xf32>
    %56 = arith.mulf %2, %50 : vector<16x128xf32>
    %57 = arith.addf %56, %55 : vector<16x128xf32>
    %58 = vector.broadcast %0 : f32 to vector<16x128xf32>
    %59 = arith.mulf %58, %57 : vector<16x128xf32>
    %60 = arith.addf %2, %59 : vector<16x128xf32>
    %c0_45 = arith.constant 0 : index
    %c0_46 = arith.constant 0 : index
    %61 = vector.load %arg17[%c0_45, %c0_46] : memref<16x128xf32, #tpu.memory_space<vmem>>, vector<16x128xf32>
    tpu.vector_store %arg17[%c0_45, %c0_46], %60 {strides = array<i32>} : memref<16x128xf32, #tpu.memory_space<vmem>>, vector<16x128xf32>,
    return
  }
  func.func @transform_0(%arg0: i32) -> (i32, i32) {
    %c0_i32 = arith.constant 0 : i32
    %c0_i32_0 = arith.constant 0 : i32
    %c0_i32_1 = arith.constant 0 : i32
    return %c0_i32, %c0_i32_0 : i32, i32
  }
  func.func @transform_1(%arg0: i32) -> (i32, i32) {
    %c0_i32 = arith.constant 0 : i32
    %c0_i32_0 = arith.constant 0 : i32
    return %arg0, %c0_i32 : i32, i32
  }
  func.func @transform_2(%arg0: i32) -> (i32, i32) {
    %c0_i32 = arith.constant 0 : i32
    %c0_i32_0 = arith.constant 0 : i32
    return %arg0, %c0_i32 : i32, i32
  }
  func.func @transform_3(%arg0: i32) -> (i32, i32) {
    %c0_i32 = arith.constant 0 : i32
    %c0_i32_0 = arith.constant 0 : i32
    %c0_i32_1 = arith.constant 0 : i32
    return %c0_i32, %c0_i32_0 : i32, i32
  }
  func.func @transform_4(%arg0: i32) -> (i32, i32) {
    %c0_i32 = arith.constant 0 : i32
    %c0_i32_0 = arith.constant 0 : i32
    %c0_i32_1 = arith.constant 0 : i32
    return %c0_i32, %c0_i32_0 : i32, i32
  }
  func.func @transform_5(%arg0: i32) -> (i32, i32) {
    %c0_i32 = arith.constant 0 : i32
    %c0_i32_0 = arith.constant 0 : i32
    %c0_i32_1 = arith.constant 0 : i32
    return %c0_i32, %c0_i32_0 : i32, i32
  }
  func.func @transform_6(%arg0: i32) -> (i32, i32) {
    %c0_i32 = arith.constant 0 : i32
    %c0_i32_0 = arith.constant 0 : i32
    %c0_i32_1 = arith.constant 0 : i32
    return %c0_i32, %c0_i32_0 : i32, i32
  }
  func.func @transform_7(%arg0: i32) -> (i32, i32) {
    %c0_i32 = arith.constant 0 : i32
    %c0_i32_0 = arith.constant 0 : i32
    %c0_i32_1 = arith.constant 0 : i32
    return %c0_i32, %c0_i32_0 : i32, i32
  }
  func.func @transform_8(%arg0: i32) -> (i32, i32) {
    %c0_i32 = arith.constant 0 : i32
    %c0_i32_0 = arith.constant 0 : i32
    %c0_i32_1 = arith.constant 0 : i32
    return %c0_i32, %c0_i32_0 : i32, i32
  }
  func.func @transform_9(%arg0: i32) -> (i32, i32) {
    %c0_i32 = arith.constant 0 : i32
    %c0_i32_0 = arith.constant 0 : i32
    %c0_i32_1 = arith.constant 0 : i32
    return %c0_i32, %c0_i32_0 : i32, i32
  }
  func.func @transform_10(%arg0: i32) -> (i32, i32) {
    %c0_i32 = arith.constant 0 : i32
    %c0_i32_0 = arith.constant 0 : i32
    %c0_i32_1 = arith.constant 0 : i32
    return %c0_i32, %c0_i32_0 : i32, i32
  }
  func.func @transform_11(%arg0: i32) -> (i32, i32) {
    %c0_i32 = arith.constant 0 : i32
    %c0_i32_0 = arith.constant 0 : i32
    %c0_i32_1 = arith.constant 0 : i32
    return %c0_i32, %c0_i32_0 : i32, i32
  }
  func.func @transform_12(%arg0: i32) -> (i32, i32) {
    %c0_i32 = arith.constant 0 : i32
    %c0_i32_0 = arith.constant 0 : i32
    %c0_i32_1 = arith.constant 0 : i32
    return %c0_i32, %c0_i32_0 : i32, i32
  }
  func.func @transform_13(%arg0: i32) -> (i32, i32) {
    %c0_i32 = arith.constant 0 : i32
    %c0_i32_0 = arith.constant 0 : i32
    %c0_i32_1 = arith.constant 0 : i32
    return %c0_i32, %c0_i32_0 : i32, i32
  }
  func.func @transform_14(%arg0: i32) -> (i32, i32) {
    %c0_i32 = arith.constant 0 : i32
    %c0_i32_0 = arith.constant 0 : i32
    %c0_i32_1 = arith.constant 0 : i32
    return %c0_i32, %c0_i32_0 : i32, i32
  }
  func.func @transform_15(%arg0: i32) -> (i32, i32) {
    %c0_i32 = arith.constant 0 : i32
    %c0_i32_0 = arith.constant 0 : i32
    %c0_i32_1 = arith.constant 0 : i32
    return %c0_i32, %c0_i32_0 : i32, i32
  }
  func.func @transform_16(%arg0: i32) -> (i32, i32) {
    %c0_i32 = arith.constant 0 : i32
    %c0_i32_0 = arith.constant 0 : i32
    return %arg0, %c0_i32 : i32, i32
  }
}

module attributes {stable_mosaic.version = 11 : i64} {
  func.func @_fuse_sft_kernel(%arg0: i32, %arg1: memref<1x1xf32, #tpu.memory_space<smem>>, %arg2: memref<16x128xbf16, #tpu.memory_space<vmem>>, %arg3: memref<16x128xf32, #tpu.memory_space<vmem>>, %arg4: memref<128x128xbf16, #tpu.memory_space<vmem>>, %arg5: memref<128x128xbf16, #tpu.memory_space<vmem>>, %arg6: memref<1x128xf32, #tpu.memory_space<vmem>>, %arg7: memref<128x128xbf16, #tpu.memory_space<vmem>>, %arg8: memref<1x128xf32, #tpu.memory_space<vmem>>, %arg9: memref<128x128xbf16, #tpu.memory_space<vmem>>, %arg10: memref<128x128xbf16, #tpu.memory_space<vmem>>, %arg11: memref<128x256xbf16, #tpu.memory_space<vmem>>, %arg12: memref<1x256xf32, #tpu.memory_space<vmem>>, %arg13: memref<128x128xbf16, #tpu.memory_space<vmem>>, %arg14: memref<1x128xf32, #tpu.memory_space<vmem>>, %arg15: memref<128x128xbf16, #tpu.memory_space<vmem>>, %arg16: memref<1x128xf32, #tpu.memory_space<vmem>>, %arg17: memref<16x128xf32, #tpu.memory_space<vmem>>) attributes {dimension_semantics = [#tpu.dimension_semantics<parallel>], iteration_bounds = array<i64: 1>, scalar_prefetch = 0 : i64, scratch_operands = 0 : i64, tpu.core_type = #tpu.core_type<tc>, window_params = [{transform_indices = @transform_0, window_bounds = array<i64: 1, 1>}, {transform_indices = @transform_1, window_bounds = array<i64: 16, 128>}, {transform_indices = @transform_2, window_bounds = array<i64: 16, 128>}, {pipeline_mode = #tpu.pipeline_mode<synchronous>, transform_indices = @transform_3, window_bounds = array<i64: 128, 128>}, {pipeline_mode = #tpu.pipeline_mode<synchronous>, transform_indices = @transform_4, window_bounds = array<i64: 128, 128>}, {pipeline_mode = #tpu.pipeline_mode<synchronous>, transform_indices = @transform_5, window_bounds = array<i64: 1, 128>}, {pipeline_mode = #tpu.pipeline_mode<synchronous>, transform_indices = @transform_6, window_bounds = array<i64: 128, 128>}, {pipeline_mode = #tpu.pipeline_mode<synchronous>, transform_indices = @transform_7, window_bounds = array<i64: 1, 128>}, {pipeline_mode = #tpu.pipeline_mode<synchronous>, transform_indices = @transform_8, window_bounds = array<i64: 128, 128>}, {pipeline_mode = #tpu.pipeline_mode<synchronous>, transform_indices = @transform_9, window_bounds = array<i64: 128, 128>}, {pipeline_mode = #tpu.pipeline_mode<synchronous>, transform_indices = @transform_10, window_bounds = array<i64: 128, 256>}, {pipeline_mode = #tpu.pipeline_mode<synchronous>, transform_indices = @transform_11, window_bounds = array<i64: 1, 256>}, {pipeline_mode = #tpu.pipeline_mode<synchronous>, transform_indices = @transform_12, window_bounds = array<i64: 128, 128>}, {pipeline_mode = #tpu.pipeline_mode<synchronous>, transform_indices = @transform_13, window_bounds = array<i64: 1, 128>}, {pipeline_mode = #tpu.pipeline_mode<synchronous>, transform_indices = @transform_14, window_bounds = array<i64: 128, 128>}, {pipeline_mode = #tpu.pipeline_mode<synchronous>, transform_indices = @transform_15, window_bounds = array<i64: 1, 128>}, {transform_indices = @transform_16, window_bounds = array<i64: 16, 128>}]} {
    %c0 = arith.constant 0 : index
    %c0_0 = arith.constant 0 : index
    %0 = memref.load %arg1[%c0, %c0_0] : memref<1x1xf32, #tpu.memory_space<smem>>
    %c0_1 = arith.constant 0 : index
    %c0_2 = arith.constant 0 : index
    %1 = vector.load %arg2[%c0_1, %c0_2] : memref<16x128xbf16, #tpu.memory_space<vmem>>, vector<16x128xbf16>
    %c0_3 = arith.constant 0 : index
    %c0_4 = arith.constant 0 : index
    %2 = vector.load %arg3[%c0_3, %c0_4] : memref<16x128xf32, #tpu.memory_space<vmem>>, vector<16x128xf32>
    %c0_5 = arith.constant 0 : index
    %c0_6 = arith.constant 0 : index
    %3 = vector.load %arg3[%c0_5, %c0_6] : memref<16x128xf32, #tpu.memory_space<vmem>>, vector<16x128xf32>
    %4 = arith.truncf %3 : vector<16x128xf32> to vector<16x128xbf16>
    %cst = arith.constant 0.000000e+00 : bf16
    %5 = vector.broadcast %cst : bf16 to vector<16x128xbf16>
    %6 = arith.maximumf %1, %5 : vector<16x128xbf16>
    %c0_7 = arith.constant 0 : index
    %c0_8 = arith.constant 0 : index
    %7 = vector.load %arg4[%c0_7, %c0_8] : memref<128x128xbf16, #tpu.memory_space<vmem>>, vector<128x128xbf16>
    %cst_9 = arith.constant dense<0.000000e+00> : vector<16x128xf32>
    %8 = tpu.matmul %6, %7, %cst_9 {dimension_numbers = #tpu.dot_dimension_numbers<[1], [0], [0], [1], [0, 0, 1, 1], [], []>} : vector<16x128xbf16>, vector<128x128xbf16>, vector<16x128xf32> -> vector<16x128xf32>
    %cst_10 = arith.constant 0.000000e+00 : bf16
    %9 = vector.broadcast %cst_10 : bf16 to vector<16x128xbf16>
    %10 = arith.maximumf %4, %9 : vector<16x128xbf16>
    %c0_11 = arith.constant 0 : index
    %c0_12 = arith.constant 0 : index
    %11 = vector.load %arg5[%c0_11, %c0_12] : memref<128x128xbf16, #tpu.memory_space<vmem>>, vector<128x128xbf16>
    %cst_13 = arith.constant dense<0.000000e+00> : vector<16x128xf32>
    %12 = tpu.matmul %10, %11, %cst_13 {dimension_numbers = #tpu.dot_dimension_numbers<[1], [0], [0], [1], [0, 0, 1, 1], [], []>} : vector<16x128xbf16>, vector<128x128xbf16>, vector<16x128xf32> -> vector<16x128xf32>
    %13 = arith.addf %8, %12 : vector<16x128xf32>
    %c0_14 = arith.constant 0 : index
    %c0_15 = arith.constant 0 : index
    %14 = vector.load %arg6[%c0_14, %c0_15] : memref<1x128xf32, #tpu.memory_space<vmem>>, vector<1x128xf32>
    %15 = vector.broadcast %14 : vector<1x128xf32> to vector<16x128xf32>
    %16 = arith.addf %13, %15 : vector<16x128xf32>
    %cst_16 = arith.constant 0.000000e+00 : f32
    %17 = vector.broadcast %cst_16 : f32 to vector<16x128xf32>
    %18 = arith.maximumf %16, %17 : vector<16x128xf32>
    %19 = arith.truncf %18 : vector<16x128xf32> to vector<16x128xbf16>
    %c0_17 = arith.constant 0 : index
    %c0_18 = arith.constant 0 : index
    %20 = vector.load %arg7[%c0_17, %c0_18] : memref<128x128xbf16, #tpu.memory_space<vmem>>, vector<128x128xbf16>
    %cst_19 = arith.constant dense<0.000000e+00> : vector<16x128xf32>
    %21 = tpu.matmul %19, %20, %cst_19 {dimension_numbers = #tpu.dot_dimension_numbers<[1], [0], [0], [1], [0, 0, 1, 1], [], []>} : vector<16x128xbf16>, vector<128x128xbf16>, vector<16x128xf32> -> vector<16x128xf32>
    %c0_20 = arith.constant 0 : index
    %c0_21 = arith.constant 0 : index
    %22 = vector.load %arg8[%c0_20, %c0_21] : memref<1x128xf32, #tpu.memory_space<vmem>>, vector<1x128xf32>
    %23 = vector.broadcast %22 : vector<1x128xf32> to vector<16x128xf32>
    %24 = arith.addf %21, %23 : vector<16x128xf32>
    %c0_22 = arith.constant 0 : index
    %c0_23 = arith.constant 0 : index
    %25 = vector.load %arg9[%c0_22, %c0_23] : memref<128x128xbf16, #tpu.memory_space<vmem>>, vector<128x128xbf16>
    %cst_24 = arith.constant dense<0.000000e+00> : vector<16x128xf32>
    %26 = tpu.matmul %1, %25, %cst_24 {dimension_numbers = #tpu.dot_dimension_numbers<[1], [0], [0], [1], [0, 0, 1, 1], [], []>} : vector<16x128xbf16>, vector<128x128xbf16>, vector<16x128xf32> -> vector<16x128xf32>
    %c0_25 = arith.constant 0 : index
    %c0_26 = arith.constant 0 : index
    %27 = vector.load %arg10[%c0_25, %c0_26] : memref<128x128xbf16, #tpu.memory_space<vmem>>, vector<128x128xbf16>
    %cst_27 = arith.constant dense<0.000000e+00> : vector<16x128xf32>
    %28 = tpu.matmul %4, %27, %cst_27 {dimension_numbers = #tpu.dot_dimension_numbers<[1], [0], [0], [1], [0, 0, 1, 1], [], []>} : vector<16x128xbf16>, vector<128x128xbf16>, vector<16x128xf32> -> vector<16x128xf32>
    %29 = arith.addf %26, %28 : vector<16x128xf32>
    %30 = arith.addf %29, %24 : vector<16x128xf32>
    %31 = arith.truncf %30 : vector<16x128xf32> to vector<16x128xbf16>
    %c0_28 = arith.constant 0 : index
    %c0_29 = arith.constant 0 : index
    %32 = vector.load %arg11[%c0_28, %c0_29] : memref<128x256xbf16, #tpu.memory_space<vmem>>, vector<128x256xbf16>
    %cst_30 = arith.constant dense<0.000000e+00> : vector<16x256xf32>
    %33 = tpu.matmul %31, %32, %cst_30 {dimension_numbers = #tpu.dot_dimension_numbers<[1], [0], [0], [1], [0, 0, 1, 1], [], []>} : vector<16x128xbf16>, vector<128x256xbf16>, vector<16x256xf32> -> vector<16x256xf32>
    %c0_31 = arith.constant 0 : index
    %c0_32 = arith.constant 0 : index
    %34 = vector.load %arg12[%c0_31, %c0_32] : memref<1x256xf32, #tpu.memory_space<vmem>>, vector<1x256xf32>
    %35 = vector.broadcast %34 : vector<1x256xf32> to vector<16x256xf32>
    %36 = arith.addf %33, %35 : vector<16x256xf32>
    %cst_33 = arith.constant 0.000000e+00 : f32
    %37 = vector.broadcast %cst_33 : f32 to vector<16x256xf32>
    %38 = arith.cmpf ogt, %36, %37 : vector<16x256xf32>
    %cst_34 = arith.constant 2.000000e-01 : f32
    %39 = vector.broadcast %cst_34 : f32 to vector<16x256xf32>
    %40 = arith.mulf %39, %36 : vector<16x256xf32>
    %41 = arith.select %38, %36, %40 : vector<16x256xi1>, vector<16x256xf32>
    %42 = vector.extract_strided_slice %41 {offsets = [0, 0], sizes = [16, 128], strides = [1, 1]} : vector<16x256xf32> to vector<16x128xf32>
    %43 = arith.truncf %42 : vector<16x128xf32> to vector<16x128xbf16>
    %44 = vector.extract_strided_slice %41 {offsets = [0, 128], sizes = [16, 128], strides = [1, 1]} : vector<16x256xf32> to vector<16x128xf32>
    %45 = arith.truncf %44 : vector<16x128xf32> to vector<16x128xbf16>
    %c0_35 = arith.constant 0 : index
    %c0_36 = arith.constant 0 : index
    %46 = vector.load %arg13[%c0_35, %c0_36] : memref<128x128xbf16, #tpu.memory_space<vmem>>, vector<128x128xbf16>
    %cst_37 = arith.constant dense<0.000000e+00> : vector<16x128xf32>
    %47 = tpu.matmul %43, %46, %cst_37 {dimension_numbers = #tpu.dot_dimension_numbers<[1], [0], [0], [1], [0, 0, 1, 1], [], []>} : vector<16x128xbf16>, vector<128x128xbf16>, vector<16x128xf32> -> vector<16x128xf32>
    %c0_38 = arith.constant 0 : index
    %c0_39 = arith.constant 0 : index
    %48 = vector.load %arg14[%c0_38, %c0_39] : memref<1x128xf32, #tpu.memory_space<vmem>>, vector<1x128xf32>
    %49 = vector.broadcast %48 : vector<1x128xf32> to vector<16x128xf32>
    %50 = arith.addf %47, %49 : vector<16x128xf32>
    %c0_40 = arith.constant 0 : index
    %c0_41 = arith.constant 0 : index
    %51 = vector.load %arg15[%c0_40, %c0_41] : memref<128x128xbf16, #tpu.memory_space<vmem>>, vector<128x128xbf16>
    %cst_42 = arith.constant dense<0.000000e+00> : vector<16x128xf32>
    %52 = tpu.matmul %45, %51, %cst_42 {dimension_numbers = #tpu.dot_dimension_numbers<[1], [0], [0], [1], [0, 0, 1, 1], [], []>} : vector<16x128xbf16>, vector<128x128xbf16>, vector<16x128xf32> -> vector<16x128xf32>
    %c0_43 = arith.constant 0 : index
    %c0_44 = arith.constant 0 : index
    %53 = vector.load %arg16[%c0_43, %c0_44] : memref<1x128xf32, #tpu.memory_space<vmem>>, vector<1x128xf32>
    %54 = vector.broadcast %53 : vector<1x128xf32> to vector<16x128xf32>
    %55 = arith.addf %52, %54 : vector<16x128xf32>
    %56 = arith.mulf %2, %50 : vector<16x128xf32>
    %57 = arith.addf %56, %55 : vector<16x128xf32>
    %58 = vector.broadcast %0 : f32 to vector<16x128xf32>
    %59 = arith.mulf %58, %57 : vector<16x128xf32>
    %60 = arith.addf %2, %59 : vector<16x128xf32>
    %c0_45 = arith.constant 0 : index
    %c0_46 = arith.constant 0 : index
    %61 = vector.load %arg17[%c0_45, %c0_46] : memref<16x128xf32, #tpu.memory_space<vmem>>, vector<16x128xf32>
    tpu.vector_store %arg17[%c0_45, %c0_46], %60 {strides = array<i32>} : memref<16x128xf32, #tpu.memory_space<vmem>>, vector<16x128xf32>,
    return
  }
  func.func @transform_0(%arg0: i32) -> (i32, i32) {
    %c0_i32 = arith.constant 0 : i32
    %c0_i32_0 = arith.constant 0 : i32
    %c0_i32_1 = arith.constant 0 : i32
    return %c0_i32, %c0_i32_0 : i32, i32
  }
  func.func @transform_1(%arg0: i32) -> (i32, i32) {
    %c0_i32 = arith.constant 0 : i32
    %c0_i32_0 = arith.constant 0 : i32
    return %arg0, %c0_i32 : i32, i32
  }
  func.func @transform_2(%arg0: i32) -> (i32, i32) {
    %c0_i32 = arith.constant 0 : i32
    %c0_i32_0 = arith.constant 0 : i32
    return %arg0, %c0_i32 : i32, i32
  }
  func.func @transform_3(%arg0: i32) -> (i32, i32) {
    %c0_i32 = arith.constant 0 : i32
    %c0_i32_0 = arith.constant 0 : i32
    %c0_i32_1 = arith.constant 0 : i32
    return %c0_i32, %c0_i32_0 : i32, i32
  }
  func.func @transform_4(%arg0: i32) -> (i32, i32) {
    %c0_i32 = arith.constant 0 : i32
    %c0_i32_0 = arith.constant 0 : i32
    %c0_i32_1 = arith.constant 0 : i32
    return %c0_i32, %c0_i32_0 : i32, i32
  }
  func.func @transform_5(%arg0: i32) -> (i32, i32) {
    %c0_i32 = arith.constant 0 : i32
    %c0_i32_0 = arith.constant 0 : i32
    %c0_i32_1 = arith.constant 0 : i32
    return %c0_i32, %c0_i32_0 : i32, i32
  }
  func.func @transform_6(%arg0: i32) -> (i32, i32) {
    %c0_i32 = arith.constant 0 : i32
    %c0_i32_0 = arith.constant 0 : i32
    %c0_i32_1 = arith.constant 0 : i32
    return %c0_i32, %c0_i32_0 : i32, i32
  }
  func.func @transform_7(%arg0: i32) -> (i32, i32) {
    %c0_i32 = arith.constant 0 : i32
    %c0_i32_0 = arith.constant 0 : i32
    %c0_i32_1 = arith.constant 0 : i32
    return %c0_i32, %c0_i32_0 : i32, i32
  }
  func.func @transform_8(%arg0: i32) -> (i32, i32) {
    %c0_i32 = arith.constant 0 : i32
    %c0_i32_0 = arith.constant 0 : i32
    %c0_i32_1 = arith.constant 0 : i32
    return %c0_i32, %c0_i32_0 : i32, i32
  }
  func.func @transform_9(%arg0: i32) -> (i32, i32) {
    %c0_i32 = arith.constant 0 : i32
    %c0_i32_0 = arith.constant 0 : i32
    %c0_i32_1 = arith.constant 0 : i32
    return %c0_i32, %c0_i32_0 : i32, i32
  }
  func.func @transform_10(%arg0: i32) -> (i32, i32) {
    %c0_i32 = arith.constant 0 : i32
    %c0_i32_0 = arith.constant 0 : i32
    %c0_i32_1 = arith.constant 0 : i32
    return %c0_i32, %c0_i32_0 : i32, i32
  }
  func.func @transform_11(%arg0: i32) -> (i32, i32) {
    %c0_i32 = arith.constant 0 : i32
    %c0_i32_0 = arith.constant 0 : i32
    %c0_i32_1 = arith.constant 0 : i32
    return %c0_i32, %c0_i32_0 : i32, i32
  }
  func.func @transform_12(%arg0: i32) -> (i32, i32) {
    %c0_i32 = arith.constant 0 : i32
    %c0_i32_0 = arith.constant 0 : i32
    %c0_i32_1 = arith.constant 0 : i32
    return %c0_i32, %c0_i32_0 : i32, i32
  }
  func.func @transform_13(%arg0: i32) -> (i32, i32) {
    %c0_i32 = arith.constant 0 : i32
    %c0_i32_0 = arith.constant 0 : i32
    %c0_i32_1 = arith.constant 0 : i32
    return %c0_i32, %c0_i32_0 : i32, i32
  }
  func.func @transform_14(%arg0: i32) -> (i32, i32) {
    %c0_i32 = arith.constant 0 : i32
    %c0_i32_0 = arith.constant 0 : i32
    %c0_i32_1 = arith.constant 0 : i32
    return %c0_i32, %c0_i32_0 : i32, i32
  }
  func.func @transform_15(%arg0: i32) -> (i32, i32) {
    %c0_i32 = arith.constant 0 : i32
    %c0_i32_0 = arith.constant 0 : i32
    %c0_i32_1 = arith.constant 0 : i32
    return %c0_i32, %c0_i32_0 : i32, i32
  }
  func.func @transform_16(%arg0: i32) -> (i32, i32) {
    %c0_i32 = arith.constant 0 : i32
    %c0_i32_0 = arith.constant 0 : i32
    return %arg0, %c0_i32 : i32, i32
  }
}

</mosaic_0001>

<bundles_post_ra>
// kernel: tpu_custom_call.1
= control target key start
LH: loop header
LB: loop body
LE: loop exit
PB: predicated region body
PF: predicated region fallthrough
CT: control target
= control target key end

     0   :  { %s2206_s0 = inlined_call_operand.<no memory space> [shape: f32[1,1], index: 0, kind: input, shape index: {}]   ;;  %s2207_s1 = inlined_call_operand.hbm [shape: bf16[16,128], index: 1, kind: input, shape index: {}]   ;;  %s2208_s2 = inlined_call_operand.hbm [shape: f32[16,128], index: 2, kind: input, shape index: {}]   ;;  %s2209_s3 = inlined_call_operand.hbm [shape: bf16[128,128], index: 3, kind: input, shape index: {}]   ;;  %s2210_s4 = inlined_call_operand.hbm [shape: bf16[128,128], index: 4, kind: input, shape index: {}]   ;;  %s2211_s5 = inlined_call_operand.vmem [shape: f32[1,128], index: 5, kind: input, shape index: {}]   ;;  %s2212_s6 = inlined_call_operand.hbm [shape: bf16[128,128], index: 6, kind: input, shape index: {}]   ;;  %s2213_s7 = inlined_call_operand.vmem [shape: f32[1,128], index: 7, kind: input, shape index: {}]   ;;  %s2214_s8 = inlined_call_operand.hbm [shape: bf16[128,128], index: 8, kind: input, shape index: {}]   ;;  %s2215_s9 = inlined_call_operand.hbm [shape: bf16[128,128], index: 9, kind: input, shape index: {}]   ;;  %s2216_s10 = inlined_call_operand.hbm [shape: bf16[128,256], index: 10, kind: input, shape index: {}]   ;;  %s2217_s11 = inlined_call_operand.vmem [shape: f32[1,256], index: 11, kind: input, shape index: {}]   ;;  %s2218_s12 = inlined_call_operand.hbm [shape: bf16[128,128], index: 12, kind: input, shape index: {}]   ;;  %s2219_s13 = inlined_call_operand.vmem [shape: f32[1,128], index: 13, kind: input, shape index: {}]   ;;  %s2220_s14 = inlined_call_operand.hbm [shape: bf16[128,128], index: 14, kind: input, shape index: {}]   ;;  %s2221_s15 = inlined_call_operand.vmem [shape: f32[1,128], index: 15, kind: input, shape index: {}]   ;;  %s2222_s16 = inlined_call_operand.hbm [shape: f32[16,128], index: 16, kind: output, shape index: {}]  }
   0x1   :  { %2224 = sst [smem:[#allocation28_spill]] %s2206_s0 }
   0x2   :  { %2225 = sst [smem:[#allocation29_spill]] %s2222_s16 }
   0x3   :  { %22 = vsyncpa [#allocation4], 0 }
   0x4   :  { %23 = vsyncpa [#allocation7], 0 }
   0x5   :  { %24 = vsyncpa [#allocation10], 0 }
   0x6   :  { %25 = vsyncpa [#allocation13], 0 }
   0x7   :  { %26 = vsyncpa [#allocation16], 0 }
   0x8   :  { %27 = vsyncpa [#allocation19], 0 }
   0x9   :  { %28 = vsyncpa [#allocation5], 0  ;;  %s1828_s21 = smov [#allocation6]   ;;  %s1572_s25 = scalar_lea.hbm %s2208_s2, 256 }
   0xa   :  { %s48_s22 = sshll.u32 %s1828_s21, 4  ;;  %p1573_p0 = scmp.ne.s32.totalorder %s2208_s2, %s1572_s25  ;;  %s49_s22 = int_to_ptr.vmem [resolvable:$true] %s48_s22 }
   0xb   :  { %p1576_p1 = scmp.lt.u32.totalorder %s1572_s25, %s2208_s2 }
   0xd   :  { %p1578_p2 = pnand %p1576_p1, %p1573_p0 }
   0xf   :  { %1581 = shalt.err (!%p1578_p2)
}
  0x10   :  { %s1582_s30 = scalar_lea.vmem %s49_s22, 256  ;;  %p1587_p4 = scmp.lt.s32.totalorder %s49_s22, %s49_s22 }
  0x11   :  { %p1583_p3 = scmp.ne.s32.totalorder %s49_s22, %s1582_s30  ;;  %p1588_p5 = scmp.lt.s32.totalorder %s1582_s30, %s1582_s30 }
  0x13   :  { %p1589_p6 = por %p1588_p5, %p1587_p4 }
  0x15   :  { %p1590_p7 = pnand %p1589_p6, %p1583_p3 }
  0x17   :  { %1593 = shalt.err (!%p1590_p7)
}
  0x18   :  { %s1829_s0 = smov 128   ;;  %s1830_s17 = smov 8  }
  0x19   :  { %54 = dma.hbm_to_vmem [thread:$0]  %s2208_s2, 256, %s49_s22, [#allocation7], %s1829_s0, %s1829_s0, %s1830_s17  }
  0x1a   :  { %s1831_s20 = smov [#allocation9]   ;;  %s1832_s23 = smov [#allocation12]  }
  0x1b   :  { %s72_s21 = sshll.u32 %s1831_s20, 4  ;;  %s100_s24 = sshll.u32 %s1832_s23, 4  ;;  %s73_s21 = int_to_ptr.vmem [resolvable:$true] %s72_s21  ;;  %s101_s24 = int_to_ptr.vmem [resolvable:$true] %s100_s24 }
  0x1c   :  { %s1594_s27 = scalar_lea.hbm %s2210_s4, 1024 }
  0x1d   :  { %p1595_p8 = scmp.ne.s32.totalorder %s2210_s4, %s1594_s27  ;;  %p1598_p9 = scmp.lt.u32.totalorder %s1594_s27, %s2210_s4 }
  0x1f   :  { %p1600_p10 = pnand %p1598_p9, %p1595_p8 }
  0x21   :  { %1603 = shalt.err (!%p1600_p10)
}
  0x22   :  { %s1604_s2 = scalar_lea.vmem %s73_s21, 1024  ;;  %p1609_p12 = scmp.lt.s32.totalorder %s73_s21, %s73_s21 }
  0x23   :  { %p1605_p11 = scmp.ne.s32.totalorder %s73_s21, %s1604_s2  ;;  %p1610_p13 = scmp.lt.s32.totalorder %s1604_s2, %s1604_s2 }
  0x25   :  { %p1611_p0 = por %p1610_p13, %p1609_p12 }
  0x27   :  { %p1612_p1 = pnand %p1611_p0, %p1605_p11 }
  0x29   :  { %1615 = shalt.err (!%p1612_p1)
}
  0x2a   :  { %s1833_s22 = smov 64   ;;  %s1834_s18 = smov 4  }
  0x2b   :  { %78 = dma.hbm_to_vmem [thread:$0]  %s2210_s4, 1024, %s73_s21, [#allocation10], %s1833_s22, %s1833_s22, %s1834_s18  }
  0x2c   :  { %s1616_s25 = scalar_lea.hbm %s2214_s8, 1024 }
  0x2d   :  { %p1617_p2 = scmp.ne.s32.totalorder %s2214_s8, %s1616_s25  ;;  %p1620_p3 = scmp.lt.u32.totalorder %s1616_s25, %s2214_s8 }
  0x2f   :  { %p1622_p4 = pnand %p1620_p3, %p1617_p2 }
  0x31   :  { %1625 = shalt.err (!%p1622_p4)
}
  0x32   :  { %s1626_s30 = scalar_lea.vmem %s101_s24, 1024  ;;  %p1631_p6 = scmp.lt.s32.totalorder %s101_s24, %s101_s24 }
  0x33   :  { %p1627_p5 = scmp.ne.s32.totalorder %s101_s24, %s1626_s30  ;;  %p1632_p7 = scmp.lt.s32.totalorder %s1626_s30, %s1626_s30 }
  0x35   :  { %p1633_p8 = por %p1632_p7, %p1631_p6 }
  0x37   :  { %p1634_p9 = pnand %p1633_p8, %p1627_p5 }
  0x39   :  { %1637 = shalt.err (!%p1634_p9)
}
  0x3a   :  { %106 = dma.hbm_to_vmem [thread:$0]  %s2214_s8, 1024, %s101_s24, [#allocation13], %s1833_s22, %s1833_s22, %s1834_s18  }
  0x3b   :  { %s1835_s2 = smov [#allocation15]   ;;  %s1836_s20 = smov [#allocation3]  }
  0x3c   :  { %s124_s19 = sshll.u32 %s1835_s2, 4  ;;  %s36_s16 = sshll.u32 %s1836_s20, 4  ;;  %s125_s19 = int_to_ptr.vmem [resolvable:$true] %s124_s19  ;;  %s37_s16 = int_to_ptr.vmem [resolvable:$true] %s36_s16 }
  0x3d   :  { %s1638_s26 = scalar_lea.hbm %s2216_s10, 2048 }
  0x3e   :  { %p1639_p10 = scmp.ne.s32.totalorder %s2216_s10, %s1638_s26  ;;  %p1642_p11 = scmp.lt.u32.totalorder %s1638_s26, %s2216_s10 }
  0x40   :  { %p1644_p12 = pnand %p1642_p11, %p1639_p10 }
  0x42   :  { %1647 = shalt.err (!%p1644_p12)
}
  0x43   :  { %s1648_s8 = scalar_lea.vmem %s125_s19, 2048  ;;  %p1653_p0 = scmp.lt.s32.totalorder %s125_s19, %s125_s19 }
  0x44   :  { %p1649_p13 = scmp.ne.s32.totalorder %s125_s19, %s1648_s8  ;;  %p1654_p1 = scmp.lt.s32.totalorder %s1648_s8, %s1648_s8 }
  0x46   :  { %p1655_p2 = por %p1654_p1, %p1653_p0 }
  0x48   :  { %p1656_p3 = pnand %p1655_p2, %p1649_p13 }
  0x4a   :  { %1659 = shalt.err (!%p1656_p3)
}
  0x4b   :  { %130 = dma.hbm_to_vmem [thread:$0]  %s2216_s10, 2048, %s125_s19, [#allocation16], %s1829_s0, %s1829_s0, %s1830_s17  }
  0x4c   :  { %s1660_s20 = scalar_lea.hbm %s2207_s1, 128 }
  0x4d   :  { %p1661_p4 = scmp.ne.s32.totalorder %s2207_s1, %s1660_s20  ;;  %p1664_p5 = scmp.lt.u32.totalorder %s1660_s20, %s2207_s1 }
  0x4f   :  { %p1666_p6 = pnand %p1664_p5, %p1661_p4 }
  0x51   :  { %1669 = shalt.err (!%p1666_p6)
}
  0x52   :  { %s1670_s28 = scalar_lea.vmem %s37_s16, 128  ;;  %p1675_p8 = scmp.lt.s32.totalorder %s37_s16, %s37_s16 }
  0x53   :  { %p1671_p7 = scmp.ne.s32.totalorder %s37_s16, %s1670_s28  ;;  %p1676_p9 = scmp.lt.s32.totalorder %s1670_s28, %s1670_s28 }
  0x55   :  { %p1677_p10 = por %p1676_p9, %p1675_p8 }
  0x57   :  { %p1678_p11 = pnand %p1677_p10, %p1671_p7 }
  0x59   :  { %1681 = shalt.err (!%p1678_p11)
}
  0x5a   :  { %42 = dma.hbm_to_vmem [thread:$0]  %s2207_s1, 128, %s37_s16, [#allocation4], %s1833_s22, %s1833_s22, %s1834_s18  }
  0x5b   :  { %s1837_s29 = smov [#allocation8]   ;;  %s1838_s8 = smov [#allocation11]  }
  0x5c   :  { %s60_s30 = sshll.u32 %s1837_s29, 4  ;;  %s86_s24 = sshll.u32 %s1838_s8, 4  ;;  %s61_s30 = int_to_ptr.vmem [resolvable:$true] %s60_s30  ;;  %s87_s24 = int_to_ptr.vmem [resolvable:$true] %s86_s24 }
  0x5d   :  { %s1682_s2 = scalar_lea.hbm %s2209_s3, 1024 }
  0x5e   :  { %p1683_p12 = scmp.ne.s32.totalorder %s2209_s3, %s1682_s2  ;;  %p1686_p13 = scmp.lt.u32.totalorder %s1682_s2, %s2209_s3 }
  0x60   :  { %p1688_p0 = pnand %p1686_p13, %p1683_p12 }
  0x62   :  { %1691 = shalt.err (!%p1688_p0)
}
  0x63   :  { %s1692_s1 = scalar_lea.vmem %s61_s30, 1024  ;;  %p1697_p2 = scmp.lt.s32.totalorder %s61_s30, %s61_s30 }
  0x64   :  { %p1693_p1 = scmp.ne.s32.totalorder %s61_s30, %s1692_s1  ;;  %p1698_p3 = scmp.lt.s32.totalorder %s1692_s1, %s1692_s1 }
  0x66   :  { %p1699_p4 = por %p1698_p3, %p1697_p2 }
  0x68   :  { %p1700_p5 = pnand %p1699_p4, %p1693_p1 }
  0x6a   :  { %1703 = shalt.err (!%p1700_p5)
}
  0x6b   :  { %66 = dma.hbm_to_vmem [thread:$0]  %s2209_s3, 1024, %s61_s30, [#allocation7], %s1833_s22, %s1833_s22, %s1834_s18  }
  0x6c   :  { %s1704_s19 = scalar_lea.hbm %s2212_s6, 1024 }
  0x6d   :  { %p1705_p6 = scmp.ne.s32.totalorder %s2212_s6, %s1704_s19  ;;  %p1708_p7 = scmp.lt.u32.totalorder %s1704_s19, %s2212_s6 }
  0x6f   :  { %p1710_p8 = pnand %p1708_p7, %p1705_p6 }
  0x71   :  { %1713 = shalt.err (!%p1710_p8)
}
  0x72   :  { %s1714_s2 = scalar_lea.vmem %s87_s24, 1024  ;;  %p1719_p10 = scmp.lt.s32.totalorder %s87_s24, %s87_s24 }
  0x73   :  { %p1715_p9 = scmp.ne.s32.totalorder %s87_s24, %s1714_s2  ;;  %p1720_p11 = scmp.lt.s32.totalorder %s1714_s2, %s1714_s2 }
  0x75   :  { %p1721_p12 = por %p1720_p11, %p1719_p10 }
  0x77   :  { %p1722_p13 = pnand %p1721_p12, %p1715_p9 }
  0x79   :  { %1725 = shalt.err (!%p1722_p13)
}
  0x7a   :  { %92 = dma.hbm_to_vmem [thread:$0]  %s2212_s6, 1024, %s87_s24, [#allocation10], %s1833_s22, %s1833_s22, %s1834_s18  }
  0x7b   :  { %s1839_s20 = smov [#allocation14]   ;;  %s1840_s25 = smov [#allocation17]  }
  0x7c   :  { %s112_s23 = sshll.u32 %s1839_s20, 4  ;;  %s138_s26 = sshll.u32 %s1840_s25, 4  ;;  %s113_s23 = int_to_ptr.vmem [resolvable:$true] %s112_s23  ;;  %s139_s26 = int_to_ptr.vmem [resolvable:$true] %s138_s26 }
  0x7d   :  { %s1726_s27 = scalar_lea.hbm %s2215_s9, 1024 }
  0x7e   :  { %p1727_p0 = scmp.ne.s32.totalorder %s2215_s9, %s1726_s27  ;;  %p1730_p1 = scmp.lt.u32.totalorder %s1726_s27, %s2215_s9 }
  0x80   :  { %p1732_p2 = pnand %p1730_p1, %p1727_p0 }
  0x82   :  { %1735 = shalt.err (!%p1732_p2)
}
  0x83   :  { %s1736_s6 = scalar_lea.vmem %s113_s23, 1024  ;;  %p1741_p4 = scmp.lt.s32.totalorder %s113_s23, %s113_s23 }
  0x84   :  { %p1737_p3 = scmp.ne.s32.totalorder %s113_s23, %s1736_s6  ;;  %p1742_p5 = scmp.lt.s32.totalorder %s1736_s6, %s1736_s6 }
  0x86   :  { %p1743_p6 = por %p1742_p5, %p1741_p4 }
  0x88   :  { %p1744_p7 = pnand %p1743_p6, %p1737_p3 }
  0x8a   :  { %1747 = shalt.err (!%p1744_p7)
}
  0x8b   :  { %118 = dma.hbm_to_vmem [thread:$0]  %s2215_s9, 1024, %s113_s23, [#allocation13], %s1833_s22, %s1833_s22, %s1834_s18  }
  0x8c   :  { %s1748_s2 = scalar_lea.hbm %s2218_s12, 1024 }
  0x8d   :  { %p1749_p8 = scmp.ne.s32.totalorder %s2218_s12, %s1748_s2  ;;  %p1752_p9 = scmp.lt.u32.totalorder %s1748_s2, %s2218_s12 }
  0x8f   :  { %p1754_p10 = pnand %p1752_p9, %p1749_p8 }
  0x91   :  { %1757 = shalt.err (!%p1754_p10)
}
  0x92   :  { %s1758_s1 = scalar_lea.vmem %s139_s26, 1024  ;;  %p1763_p12 = scmp.lt.s32.totalorder %s139_s26, %s139_s26 }
  0x93   :  { %p1759_p11 = scmp.ne.s32.totalorder %s139_s26, %s1758_s1  ;;  %p1764_p13 = scmp.lt.s32.totalorder %s1758_s1, %s1758_s1 }
  0x95   :  { %p1765_p0 = por %p1764_p13, %p1763_p12 }
  0x97   :  { %p1766_p1 = pnand %p1765_p0, %p1759_p11 }
  0x99   :  { %1769 = shalt.err (!%p1766_p1)
}
  0x9a   :  { %144 = dma.hbm_to_vmem [thread:$0]  %s2218_s12, 1024, %s139_s26, [#allocation16], %s1833_s22, %s1833_s22, %s1834_s18  }
  0x9b   :  { %s1841_s16 = smov [#allocation18]   ;;  %s1770_s19 = scalar_lea.hbm %s2220_s14, 1024 }
  0x9c   :  { %s152_s27 = sshll.u32 %s1841_s16, 4  ;;  %p1771_p2 = scmp.ne.s32.totalorder %s2220_s14, %s1770_s19  ;;  %s153_s27 = int_to_ptr.vmem [resolvable:$true] %s152_s27 }
  0x9d   :  { %p1774_p3 = scmp.lt.u32.totalorder %s1770_s19, %s2220_s14 }
  0x9f   :  { %p1776_p4 = pnand %p1774_p3, %p1771_p2 }
  0xa1   :  { %1779 = shalt.err (!%p1776_p4)
}
  0xa2   :  { %s1780_s4 = scalar_lea.vmem %s153_s27, 1024  ;;  %p1785_p6 = scmp.lt.s32.totalorder %s153_s27, %s153_s27 }
  0xa3   :  { %p1781_p5 = scmp.ne.s32.totalorder %s153_s27, %s1780_s4  ;;  %p1786_p7 = scmp.lt.s32.totalorder %s1780_s4, %s1780_s4 }
  0xa5   :  { %p1787_p8 = por %p1786_p7, %p1785_p6 }
  0xa7   :  { %p1788_p9 = pnand %p1787_p8, %p1781_p5 }
  0xa9   :  { %1791 = shalt.err (!%p1788_p9)
}
  0xaa   :  { %158 = dma.hbm_to_vmem [thread:$0]  %s2220_s14, 1024, %s153_s27, [#allocation19], %s1833_s22, %s1833_s22, %s1834_s18  }
  0xab   :  { %1814 = dma.done.wait [#allocation4], 128  }
  0xac   :  { %1815 = vsyncadd [#allocation4], 4294967168 }
  0xad   :  { %1816 = dma.done.wait [#allocation7], 1280  }
  0xae   :  { %1817 = vsyncadd [#allocation7], 4294966016 }
  0xaf   :  { %1818 = dma.done.wait [#allocation10], 2048  }
  0xb0   :  { %1819 = vsyncadd [#allocation10], 4294965248 }
  0xb1   :  { %1820 = dma.done.wait [#allocation13], 2048  }
  0xb2   :  { %1821 = vsyncadd [#allocation13], 4294965248 }
  0xb3   :  { %1822 = dma.done.wait [#allocation16], 3072  }
  0xb4   :  { %1823 = vsyncadd [#allocation16], 4294964224 }
  0xb5   :  { %1824 = dma.done.wait [#allocation19], 1024  }
  0xb6   :  { %1825 = vsyncadd [#allocation19], 4294966272  ;;  %v1842_v0 = vmov 0.0   ;;  %vm1843_vm0 = vmmov 0   ;;  %v1491_v1 = vld [vmem:[#allocation9] sm:$0xff]   ;;  %v1493_v3 = vld [vmem:[#allocation9 + $0x8] sm:$0xff]  }
  0xb7   :  { %1323 = vmatprep.subr.bf16.mxu0 %v1842_v0  ;;  %1343 = vmatprep.subr.bf16.mxu1 %v1842_v0  ;;  %v1492_v2 = vld [vmem:[#allocation8] sm:$0xff]   ;;  %v1494_v4 = vld [vmem:[#allocation8 + $0x8] sm:$0xff]   ;;  %v1495_v5 = vld [vmem:[#allocation9 + $0x10] sm:$0xff]   ;;  %v1844_v22 = vmov 0   ;;  %s2226_s1 = sld [smem:[#allocation28_spill]] }
  0xb8   :  { %1339 = vmatprep.mubr.msk.bf16.mxu0 %vm1843_vm0, %v1842_v0  ;;  %1359 = vmatprep.mubr.msk.bf16.mxu1 %vm1843_vm0, %v1842_v0  ;;  %v1496_v6 = vld [vmem:[#allocation8 + $0x10] sm:$0xff]   ;;  %v1497_v7 = vld [vmem:[#allocation9 + $0x18] sm:$0xff]   ;;  %v1499_v9 = vld [vmem:[#allocation9 + $0x20] sm:$0xff]  }
  0xb9   :  { %1324 = vmatpush3.bf16.msra.mxu0 %v1491_v1  ;;  %1344 = vmatpush3.bf16.msra.mxu1 %v1492_v2  ;;  %v1498_v8 = vld [vmem:[#allocation8 + $0x18] sm:$0xff]   ;;  %v1500_v10 = vld [vmem:[#allocation8 + $0x20] sm:$0xff]   ;;  %v1501_v11 = vld [vmem:[#allocation9 + $0x28] sm:$0xff]  }
  0xba   :  { %1325 = vmatprep.subr.bf16.mxu0 %v1842_v0  ;;  %1345 = vmatprep.subr.bf16.mxu1 %v1842_v0  ;;  %v1502_v12 = vld [vmem:[#allocation8 + $0x28] sm:$0xff]   ;;  %v1503_v13 = vld [vmem:[#allocation9 + $0x30] sm:$0xff]   ;;  %v2099_v16 = vld [vmem:[#allocation6 + $0x8] sm:$0xff] }
  0xbb   :  { %v2097_v14 = vld [vmem:[#allocation6] sm:$0xff]  ;;  %v2101_v17 = vld [vmem:[#allocation3] sm:$0xf]  ;;  %v2104_v18 = vld [vmem:[#allocation3 + $0x4] sm:$0xf] }
  0xbc   :  { %v1504_v15 = vld [vmem:[#allocation8 + $0x30] sm:$0xff]   ;;  %v1505_v19 = vld [vmem:[#allocation9 + $0x38] sm:$0xff]   ;;  %v2109_v21 = vpack.c.bf16 %v2099_v16, %v2097_v14  ;;  %v198_v23 = vmax.bf16 %v1844_v22, %v2101_v17  ;;  %v199_v24 = vmax.bf16 %v1844_v22, %v2104_v18  ;;  %v1507_v25 = vld [vmem:[#allocation11] sm:$0xff]  }
  0xbd   :  { %1326 = vmatpush3.bf16.msra.mxu0 %v1493_v3  ;;  %1346 = vmatpush3.bf16.msra.mxu1 %v1494_v4  ;;  %v1506_v20 = vld [vmem:[#allocation8 + $0x38] sm:$0xff]   ;;  %v1508_v28 = vld [vmem:[#allocation11 + $0x8] sm:$0xff]   ;;  %v1509_v29 = vld [vmem:[#allocation11 + $0x10] sm:$0xff]  }
  0xbe   :  { %1327 = vmatprep.subr.bf16.mxu0 %v1842_v0  ;;  %1347 = vmatprep.subr.bf16.mxu1 %v1842_v0  ;;  %v216_v26 = vmax.bf16 %v1844_v22, %v2109_v21  ;;  %v1190_v27 = vcombine.low %v198_v23, %v199_v24  ;;  %v1510_v30 = vld [vmem:[#allocation11 + $0x18] sm:$0xff]   ;;  %v1511_v31 = vld [vmem:[#allocation11 + $0x20] sm:$0xff]   ;;  %v1512_v32 = vld [vmem:[#allocation11 + $0x28] sm:$0xff]  }
  0xbf   :  { %v1513_v33 = vld [vmem:[#allocation11 + $0x30] sm:$0xff]   ;;  %v1514_v34 = vld [vmem:[#allocation11 + $0x38] sm:$0xff]   ;;  %v1532_v35 = vld [vmem:[#allocation15] ss:$8 sps:$4 sm:$0xff]  }
  0xc0   :  { %v1534_v36 = vld [vmem:[#allocation15 + $0x4] ss:$8 sps:$4 sm:$0xff]   ;;  %v1537_v37 = vld [vmem:[#allocation15 + $0x14] ss:$8 sps:$4 sm:$0xff]   ;;  %v1535_v38 = vld [vmem:[#allocation15 + $0x10] ss:$8 sps:$4 sm:$0xff]  }
  0xc1   :  { %1328 = vmatpush3.bf16.msra.mxu0 %v1495_v5  ;;  %1348 = vmatpush3.bf16.msra.mxu1 %v1496_v6  ;;  %v1540_v39 = vld [vmem:[#allocation15 + $0x24] ss:$8 sps:$4 sm:$0xff]   ;;  %v1538_v40 = vld [vmem:[#allocation15 + $0x20] ss:$8 sps:$4 sm:$0xff]   ;;  %v1543_v41 = vld [vmem:[#allocation15 + $0x34] ss:$8 sps:$4 sm:$0xff]  }
  0xc2   :  { %1329 = vmatprep.subr.bf16.mxu0 %v1842_v0  ;;  %1349 = vmatprep.subr.bf16.mxu1 %v1842_v0  ;;  %v1541_v42 = vld [vmem:[#allocation15 + $0x30] ss:$8 sps:$4 sm:$0xff]   ;;  %v1546_v43 = vld [vmem:[#allocation15 + $0x44] ss:$8 sps:$4 sm:$0xff]   ;;  %v1544_v44 = vld [vmem:[#allocation15 + $0x40] ss:$8 sps:$4 sm:$0xff]  }
  0xc3   :  { %v1549_v45 = vld [vmem:[#allocation15 + $0x54] ss:$8 sps:$4 sm:$0xff]   ;;  %v1547_v46 = vld [vmem:[#allocation15 + $0x50] ss:$8 sps:$4 sm:$0xff]   ;;  %v1552_v47 = vld [vmem:[#allocation15 + $0x64] ss:$8 sps:$4 sm:$0xff]  }
  0xc4   :  { %v1550_v48 = vld [vmem:[#allocation15 + $0x60] ss:$8 sps:$4 sm:$0xff]   ;;  %v1517_v4 = vld [vmem:[#allocation14 + $0x10] sm:$0xff]   ;;  %v1518_v5 = vld [vmem:[#allocation14 + $0x18] sm:$0xff]  }
  0xc5   :  { %1330 = vmatpush3.bf16.msra.mxu0 %v1497_v7  ;;  %1350 = vmatpush3.bf16.msra.mxu1 %v1498_v8  ;;  %v1199_v51 = vld [vmem:[%s2211_s5] ss:$0 sm:$0xff]  ;;  %v1515_v1 = vld [vmem:[#allocation14] sm:$0xff]   ;;  %v1521_v8 = vld [vmem:[#allocation14 + $0x30] sm:$0xff]  }
  0xc6   :  { %1331 = vmatprep.subr.bf16.mxu0 %v1842_v0  ;;  %1351 = vmatprep.subr.bf16.mxu1 %v1842_v0  ;;  %v1516_v3 = vld [vmem:[#allocation14 + $0x8] sm:$0xff]   ;;  %v1519_v6 = vld [vmem:[#allocation14 + $0x20] sm:$0xff]   ;;  %v1555_v23 = vld [vmem:[#allocation15 + $0x74] ss:$8 sps:$4 sm:$0xff]  }
  0xc7   :  { %v1520_v7 = vld [vmem:[#allocation14 + $0x28] sm:$0xff]   ;;  %v1553_v24 = vld [vmem:[#allocation15 + $0x70] ss:$8 sps:$4 sm:$0xff]  }
  0xc9   :  { %1332 = vmatpush3.bf16.msra.mxu0 %v1499_v9  ;;  %1352 = vmatpush3.bf16.msra.mxu1 %v1500_v10  ;;  %v1522_v9 = vld [vmem:[#allocation14 + $0x38] sm:$0xff]   ;;  %v1523_v10 = vld [vmem:[#allocation12] sm:$0xff]  }
  0xca   :  { %1333 = vmatprep.subr.bf16.mxu0 %v1842_v0  ;;  %1353 = vmatprep.subr.bf16.mxu1 %v1842_v0 }
  0xcd   :  { %1334 = vmatpush3.bf16.msra.mxu0 %v1501_v11  ;;  %1354 = vmatpush3.bf16.msra.mxu1 %v1502_v12  ;;  %v1524_v11 = vld [vmem:[#allocation12 + $0x8] sm:$0xff]   ;;  %v1525_v12 = vld [vmem:[#allocation12 + $0x10] sm:$0xff]  }
  0xce   :  { %1335 = vmatprep.subr.bf16.mxu0 %v1842_v0  ;;  %1355 = vmatprep.subr.bf16.mxu1 %v1842_v0 }
  0xd1   :  { %1336 = vmatpush3.bf16.msra.mxu0 %v1503_v13  ;;  %1356 = vmatpush3.bf16.msra.mxu1 %v1504_v15  ;;  %v1526_v13 = vld [vmem:[#allocation12 + $0x18] sm:$0xff]   ;;  %v1527_v15 = vld [vmem:[#allocation12 + $0x20] sm:$0xff]  }
  0xd2   :  { %1337 = vmatprep.subr.bf16.mxu0 %v1842_v0  ;;  %1357 = vmatprep.subr.bf16.mxu1 %v1842_v0 }
  0xd5   :  { %1338 = vmatpush3.bf16.msra.mxu0 %v1505_v19  ;;  %1358 = vmatpush3.bf16.msra.mxu1 %v1506_v20  ;;  %v1528_v19 = vld [vmem:[#allocation12 + $0x28] sm:$0xff]   ;;  %v1529_v20 = vld [vmem:[#allocation12 + $0x30] sm:$0xff]  }
  0xd6   :  { %1363 = vmatprep.subr.bf16.mxu0 %v1842_v0  ;;  %868 = vmatprep.subr.bf16.mxu1 %v1534_v36  ;;  %v1561_v36 = vld [vmem:[#allocation17 + $0x28] sm:$0xff]  }
  0xd8   :  { %1340 = vmatmul.mubr.bf16.vlgmr.msra.gmra.mrb[0].mxu0 %v216_v26  ;;  %1360 = vmatmul.mubr.bf16.vlgmr.msra.gmra.mrb[0].mxu1 %v1190_v27 }
  0xd9   :  { %1364 = vmatpush3.bf16.msra.mxu0 %v1507_v25  ;;  %1379 = vmatprep.mubr.msk.bf16.mxu0 %vm1843_vm0, %v1842_v0  ;;  %v1200_v25 = vld [vmem:[%s2213_s7] ss:$0 sm:$0xff] }
  0xda   :  { %1365 = vmatprep.subr.bf16.mxu0 %v1842_v0  ;;  %900 = vmatprep.mubr.bf16.mxu1 %v1844_v22  ;;  %v1217_v22 = vcombine.low %v2101_v17, %v2104_v18  ;;  %v1557_v18 = vld [vmem:[#allocation17 + $0x8] sm:$0xff]  }
  0xdb   :  { %869 = vmatpush1.bf16.msra.mxu1 %v1532_v35  ;;  %v1560_v35 = vld [vmem:[#allocation17 + $0x20] sm:$0xff]  }
  0xdc   :  { %870 = vmatprep.subr.bf16.mxu1 %v1537_v37  ;;  %v1562_v37 = vld [vmem:[#allocation17 + $0x30] sm:$0xff]  }
  0xdd   :  { %1366 = vmatpush3.bf16.msra.mxu0 %v1508_v28 }
  0xde   :  { %1367 = vmatprep.subr.bf16.mxu0 %v1842_v0 }
  0xdf   :  { %871 = vmatpush1.bf16.msra.mxu1 %v1535_v38  ;;  %v1563_v38 = vld [vmem:[#allocation17 + $0x38] sm:$0xff]  }
  0xe0   :  { %872 = vmatprep.subr.bf16.mxu1 %v1540_v39  ;;  %v778_v39 = vlaneseq }
  0xe1   :  { %1368 = vmatpush3.bf16.msra.mxu0 %v1509_v29 }
  0xe2   :  { %1369 = vmatprep.subr.bf16.mxu0 %v1842_v0 }
  0xe3   :  { %873 = vmatpush1.bf16.msra.mxu1 %v1538_v40  ;;  %v779_v40 = vshrl.u32 %v778_v39, 7 }
  0xe4   :  { %874 = vmatprep.subr.bf16.mxu1 %v1543_v41 }
  0xe5   :  { %1370 = vmatpush3.bf16.msra.mxu0 %v1510_v30  ;;  %v780_v41 = vsub.s32 0, %v779_v40 }
  0xe6   :  { %1371 = vmatprep.subr.bf16.mxu0 %v1842_v0 }
  0xe7   :  { %875 = vmatpush1.bf16.msra.mxu1 %v1541_v42  ;;  %v776_v42 = vld [vmem:[%s2217_s11] sm:$0x3] }
  0xe8   :  { %876 = vmatprep.subr.bf16.mxu1 %v1546_v43  ;;  %v784_v43 = vsub.s32 1, %v779_v40 }
  0xe9   :  { %1372 = vmatpush3.bf16.msra.mxu0 %v1511_v31 }
  0xea   :  { %1373 = vmatprep.subr.bf16.mxu0 %v1842_v0 }
  0xeb   :  { %877 = vmatpush1.bf16.msra.mxu1 %v1544_v44  ;;  %v781_v44 = vrot.slane %v776_v42, %v780_v41 }
  0xec   :  { %878 = vmatprep.subr.bf16.mxu1 %v1549_v45  ;;  %v785_v45 = vrot.slane %v776_v42, %v784_v43 }
  0xed   :  { %1374 = vmatpush3.bf16.msra.mxu0 %v1512_v32  ;;  %v1556_v32 = vld [vmem:[#allocation17] sm:$0xff]  }
  0xee   :  { %1375 = vmatprep.subr.bf16.mxu0 %v1842_v0 }
  0xef   :  { %879 = vmatpush1.bf16.msra.mxu1 %v1547_v46 }
  0xf0   :  { %880 = vmatprep.subr.bf16.mxu1 %v1552_v47 }
  0xf1   :  { %1376 = vmatpush3.bf16.msra.mxu0 %v1513_v33  ;;  %v1558_v33 = vld [vmem:[#allocation17 + $0x10] sm:$0xff]  }
  0xf2   :  { %1377 = vmatprep.subr.bf16.mxu0 %v1842_v0 }
  0xf3   :  { %881 = vmatpush1.bf16.msra.mxu1 %v1550_v48 }
  0xf4   :  { %882 = vmatprep.subr.bf16.mxu1 %v1555_v23 }
  0xf5   :  { %1378 = vmatpush3.bf16.msra.mxu0 %v1514_v34  ;;  %v1559_v34 = vld [vmem:[#allocation17 + $0x18] sm:$0xff]  }
  0xf6   :  { %1383 = vmatprep.subr.bf16.mxu0 %v1842_v0 }
  0xf7   :  { %883 = vmatpush1.bf16.msra.mxu1 %v1553_v24  ;;  %v1153_v24 = vstv %s2226_s1 }
  0xf8   :  { %1423 = vmatprep.subr.bf16.mxu1 %v1842_v0 }
 0x1ab   :  { %v315_v49 = vpop.f32.mrb[0].mxu0  ;;  %v410_v50 = vpop.f32.mrb[0].mxu1 }
 0x1ac   :  { %v1341_v52 = vpop.f32.mrb[1].mxu0  ;;  %v411_v53 = vadd.f32 %v410_v50, %v315_v49  ;;  %v1361_v54 = vpop.f32.mrb[1].mxu1 }
 0x1ad   :  { %v318_v55 = vpop.f32.mrb[2].mxu0  ;;  %v413_v56 = vpop.f32.mrb[2].mxu1 }
 0x1ae   :  { %v1342_v57 = vpop.f32.mrb[3].mxu0  ;;  %v424_v58 = vadd.f32 %v1199_v51, %v411_v53  ;;  %v414_v59 = vadd.f32 %v413_v56, %v318_v55  ;;  %v1362_v60 = vpop.f32.mrb[3].mxu1 }
 0x1af   :  { %v1564_v60 = vld [vmem:[#allocation18] sm:$0xff]  }
 0x1b0   :  { %v425_v61 = vadd.f32 %v1199_v51, %v414_v59  ;;  %v426_v62 = vmax.f32 %v424_v58, 0.0 }
 0x1b2   :  { %v427_v63 = vmax.f32 %v425_v61, 0.0 }
 0x1b4   :  { %v428_v2 = vpack.c.bf16 %v427_v63, %v426_v62 }
 0x1b6   :  { %1380 = vmatmul.mubr.bf16.vlgmr.msra.gmra.mrb[4].mxu0 %v428_v2  ;;  %v1565_v2 = vld [vmem:[#allocation18 + $0x8] sm:$0xff]  }
 0x1b7   :  { %1384 = vmatpush3.bf16.msra.mxu0 %v1515_v1  ;;  %1399 = vmatprep.mubr.msk.bf16.mxu0 %vm1843_vm0, %v1842_v0 }
 0x1b8   :  { %1385 = vmatprep.subr.bf16.mxu0 %v1842_v0 }
 0x1bb   :  { %1386 = vmatpush3.bf16.msra.mxu0 %v1516_v3  ;;  %v1566_v3 = vld [vmem:[#allocation18 + $0x10] sm:$0xff]  }
 0x1bc   :  { %1387 = vmatprep.subr.bf16.mxu0 %v1842_v0 }
 0x1bf   :  { %1388 = vmatpush3.bf16.msra.mxu0 %v1517_v4  ;;  %v1567_v4 = vld [vmem:[#allocation18 + $0x18] sm:$0xff]  }
 0x1c0   :  { %1389 = vmatprep.subr.bf16.mxu0 %v1842_v0 }
 0x1c3   :  { %1390 = vmatpush3.bf16.msra.mxu0 %v1518_v5  ;;  %v1568_v5 = vld [vmem:[#allocation18 + $0x20] sm:$0xff]  }
 0x1c4   :  { %1391 = vmatprep.subr.bf16.mxu0 %v1842_v0 }
 0x1c7   :  { %1392 = vmatpush3.bf16.msra.mxu0 %v1519_v6  ;;  %v1569_v6 = vld [vmem:[#allocation18 + $0x28] sm:$0xff]  }
 0x1c8   :  { %1393 = vmatprep.subr.bf16.mxu0 %v1842_v0 }
 0x1cb   :  { %1394 = vmatpush3.bf16.msra.mxu0 %v1520_v7  ;;  %v1570_v7 = vld [vmem:[#allocation18 + $0x30] sm:$0xff]  }
 0x1cc   :  { %1395 = vmatprep.subr.bf16.mxu0 %v1842_v0 }
 0x1cf   :  { %1396 = vmatpush3.bf16.msra.mxu0 %v1521_v8  ;;  %v1571_v8 = vld [vmem:[#allocation18 + $0x38] sm:$0xff]  }
 0x1d0   :  { %1397 = vmatprep.subr.bf16.mxu0 %v1842_v0 }
 0x1d3   :  { %1398 = vmatpush3.bf16.msra.mxu0 %v1522_v9 }
 0x1d4   :  { %1403 = vmatprep.subr.bf16.mxu0 %v1842_v0 }
 0x1d6   :  { %1400 = vmatmul.mubr.bf16.vlgmr.msra.gmra.mrb[4].mxu0 %v2109_v21  ;;  %v1530_v21 = vld [vmem:[#allocation12 + $0x38] sm:$0xff]  }
 0x1d7   :  { %1404 = vmatpush3.bf16.msra.mxu0 %v1523_v10  ;;  %1419 = vmatprep.mubr.msk.bf16.mxu0 %vm1843_vm0, %v1842_v0 }
 0x1d8   :  { %1405 = vmatprep.subr.bf16.mxu0 %v1842_v0 }
 0x1db   :  { %1406 = vmatpush3.bf16.msra.mxu0 %v1524_v11 }
 0x1dc   :  { %1407 = vmatprep.subr.bf16.mxu0 %v1842_v0 }
 0x1df   :  { %1408 = vmatpush3.bf16.msra.mxu0 %v1525_v12 }
 0x1e0   :  { %1409 = vmatprep.subr.bf16.mxu0 %v1842_v0 }
 0x1e3   :  { %1410 = vmatpush3.bf16.msra.mxu0 %v1526_v13  ;;  %v1242_v13 = vld [vmem:[%s2219_s13] ss:$0 sm:$0xff]  ;;  %s1845_s13 = smov [#allocation20]  }
 0x1e4   :  { %1411 = vmatprep.subr.bf16.mxu0 %v1842_v0 }
 0x1e7   :  { %1412 = vmatpush3.bf16.msra.mxu0 %v1527_v15 }
 0x1e8   :  { %1413 = vmatprep.subr.bf16.mxu0 %v1842_v0 }
 0x1eb   :  { %1414 = vmatpush3.bf16.msra.mxu0 %v1528_v19  ;;  %v1251_v19 = vld [vmem:[%s2221_s15] ss:$0 sm:$0xff]  ;;  %s1165_s15 = sshll.u32 %s1845_s13, 4  ;;  %s1166_s15 = int_to_ptr.vmem [resolvable:$true] %s1165_s15 }
 0x1ec   :  { %1415 = vmatprep.subr.bf16.mxu0 %v1842_v0  ;;  %s1792_s9 = scalar_lea.vmem %s1166_s15, 256  ;;  %p1797_p11 = scmp.lt.s32.totalorder %s1166_s15, %s1166_s15 }
 0x1ed   :  { %p1793_p10 = scmp.ne.s32.totalorder %s1166_s15, %s1792_s9  ;;  %p1798_p12 = scmp.lt.s32.totalorder %s1792_s9, %s1792_s9 }
 0x1ef   :  { %1416 = vmatpush3.bf16.msra.mxu0 %v1529_v20  ;;  %p1799_p13 = por %p1798_p12, %p1797_p11 }
 0x1f0   :  { %1417 = vmatprep.subr.bf16.mxu0 %v1842_v0 }
 0x1f1   :  { %p1800_p0 = pnand %p1799_p13, %p1793_p10 }
 0x1f3   :  { %1418 = vmatpush3.bf16.msra.mxu0 %v1530_v21 }
 0x1f6   :  { %1420 = vmatmul.mubr.bf16.vlgmr.msra.gmra.mrb[4].mxu0 %v1217_v22 }
 0x2c9   :  { %v750_v26 = vpop.f32.mrb[4].mxu0 }
 0x2ca   :  { %v1421_v27 = vpop.f32.mrb[5].mxu0  ;;  %v1463_v29 = vadd.f32 %v1200_v25, %v750_v26 }
 0x2cb   :  { %v753_v28 = vpop.f32.mrb[6].mxu0 }
 0x2cc   :  { %v1464_v30 = vadd.f32 %v1200_v25, %v753_v28  ;;  %v1422_v31 = vpop.f32.mrb[7].mxu0 }
 0x2ce   :  { %v759_v17 = vpack.c.bf16 %v1464_v30, %v1463_v29 }
 0x2d0   :  { %901 = vmatmul.mubr.bf16.vlgmr.msra.gmra.mrb[4].mxu1 %v759_v17 }
 0x2d1   :  { %1424 = vmatpush3.bf16.msra.mxu1 %v1556_v32  ;;  %1439 = vmatprep.mubr.msk.bf16.mxu1 %vm1843_vm0, %v1842_v0 }
 0x2d2   :  { %1425 = vmatprep.subr.bf16.mxu1 %v1842_v0 }
 0x2d5   :  { %1426 = vmatpush3.bf16.msra.mxu1 %v1557_v18 }
 0x2d6   :  { %1427 = vmatprep.subr.bf16.mxu1 %v1842_v0 }
 0x2d9   :  { %1428 = vmatpush3.bf16.msra.mxu1 %v1558_v33 }
 0x2da   :  { %1429 = vmatprep.subr.bf16.mxu1 %v1842_v0 }
 0x2dd   :  { %1430 = vmatpush3.bf16.msra.mxu1 %v1559_v34 }
 0x2de   :  { %1431 = vmatprep.subr.bf16.mxu1 %v1842_v0 }
 0x2e1   :  { %1432 = vmatpush3.bf16.msra.mxu1 %v1560_v35 }
 0x2e2   :  { %1433 = vmatprep.subr.bf16.mxu1 %v1842_v0 }
 0x2e5   :  { %1434 = vmatpush3.bf16.msra.mxu1 %v1561_v36 }
 0x2e6   :  { %1435 = vmatprep.subr.bf16.mxu1 %v1842_v0 }
 0x2e9   :  { %1436 = vmatpush3.bf16.msra.mxu1 %v1562_v37 }
 0x2ea   :  { %1437 = vmatprep.subr.bf16.mxu1 %v1842_v0 }
 0x2ed   :  { %1438 = vmatpush3.bf16.msra.mxu1 %v1563_v38 }
 0x2ee   :  { %1443 = vmatprep.subr.bf16.mxu1 %v1842_v0 }
 0x3a3   :  { %v902_v46 = vpop.f32.mrb[4].mxu1 }
 0x3a4   :  { %v903_v47 = vadd.f32 %v902_v46, %v781_v44  ;;  %v904_v48 = vpop.f32.mrb[5].mxu1 }
 0x3a5   :  { %v905_v49 = vadd.f32 %v904_v48, %v785_v45  ;;  %v906_v50 = vpop.f32.mrb[6].mxu1 }
 0x3a6   :  { %v915_v51 = vmul.f32 0.2, %v903_v47  ;;  %v907_v52 = vadd.f32 %v906_v50, %v781_v44  ;;  %v908_v53 = vpop.f32.mrb[7].mxu1  ;;  %vm911_vm1 = vcmp.gt.f32.partialorder %v903_v47, 0.0 }
 0x3a7   :  { %v916_v54 = vmul.f32 0.2, %v905_v49  ;;  %v909_v55 = vadd.f32 %v908_v53, %v785_v45  ;;  %vm912_vm2 = vcmp.gt.f32.partialorder %v905_v49, 0.0 }
 0x3a8   :  { %vm913_vm3 = vcmp.gt.f32.partialorder %v907_v52, 0.0  ;;  %v917_v56 = vmul.f32 0.2, %v907_v52  ;;  %v919_v58 = vsel %vm911_vm1, %v903_v47, %v915_v51 }
 0x3a9   :  { %vm914_vm4 = vcmp.gt.f32.partialorder %v909_v55, 0.0  ;;  %v918_v57 = vmul.f32 0.2, %v909_v55  ;;  %v920_v61 = vsel %vm912_vm2, %v905_v49, %v916_v54 }
 0x3aa   :  { %v921_v59 = vsel %vm913_vm3, %v907_v52, %v917_v56 }
 0x3ab   :  { %v923_v62 = vpack.c.bf16 %v921_v59, %v919_v58  ;;  %v922_v63 = vsel %vm914_vm4, %v909_v55, %v918_v57 }
 0x3ac   :  { %v924_v1 = vpack.c.bf16 %v922_v63, %v920_v61 }
 0x3ad   :  { %1440 = vmatmul.mubr.bf16.vlgmr.msra.gmra.mrb[8].mxu1 %v923_v62 }
 0x3ae   :  { %1444 = vmatpush3.bf16.msra.mxu1 %v1564_v60  ;;  %1459 = vmatprep.mubr.msk.bf16.mxu1 %vm1843_vm0, %v1842_v0 }
 0x3af   :  { %1445 = vmatprep.subr.bf16.mxu1 %v1842_v0 }
 0x3b2   :  { %1446 = vmatpush3.bf16.msra.mxu1 %v1565_v2 }
 0x3b3   :  { %1447 = vmatprep.subr.bf16.mxu1 %v1842_v0 }
 0x3b6   :  { %1448 = vmatpush3.bf16.msra.mxu1 %v1566_v3 }
 0x3b7   :  { %1449 = vmatprep.subr.bf16.mxu1 %v1842_v0 }
 0x3ba   :  { %1450 = vmatpush3.bf16.msra.mxu1 %v1567_v4 }
 0x3bb   :  { %1451 = vmatprep.subr.bf16.mxu1 %v1842_v0 }
 0x3be   :  { %1452 = vmatpush3.bf16.msra.mxu1 %v1568_v5 }
 0x3bf   :  { %1453 = vmatprep.subr.bf16.mxu1 %v1842_v0 }
 0x3c2   :  { %1454 = vmatpush3.bf16.msra.mxu1 %v1569_v6 }
 0x3c3   :  { %1455 = vmatprep.subr.bf16.mxu1 %v1842_v0 }
 0x3c6   :  { %1456 = vmatpush3.bf16.msra.mxu1 %v1570_v7 }
 0x3c7   :  { %1457 = vmatprep.subr.bf16.mxu1 %v1842_v0 }
 0x3ca   :  { %1458 = vmatpush3.bf16.msra.mxu1 %v1571_v8 }
 0x3cd   :  { %1460 = vmatmul.mubr.bf16.vlgmr.msra.gmra.mrb[12].mxu1 %v924_v1 }
 0x480   :  { %v1030_v9 = vpop.f32.mrb[8].mxu1 }
 0x481   :  { %v1441_v10 = vpop.f32.mrb[9].mxu1  ;;  %v1031_v15 = vadd.f32 %v1242_v13, %v1030_v9 }
 0x482   :  { %v1033_v11 = vpop.f32.mrb[10].mxu1 }
 0x483   :  { %v1442_v12 = vpop.f32.mrb[11].mxu1  ;;  %v1034_v20 = vadd.f32 %v1242_v13, %v1033_v11  ;;  %v1149_v22 = vmul.f32 %v1031_v15, %v2097_v14 }
 0x485   :  { %v1150_v26 = vmul.f32 %v1034_v20, %v2099_v16 }
 0x4a0   :  { %v1142_v21 = vpop.f32.mrb[12].mxu1 }
 0x4a1   :  { %v1143_v0 = vadd.f32 %v1251_v19, %v1142_v21  ;;  %v1461_v23 = vpop.f32.mrb[13].mxu1 }
 0x4a2   :  { %v1145_v25 = vpop.f32.mrb[14].mxu1 }
 0x4a3   :  { %v1151_v27 = vadd.f32 %v1149_v22, %v1143_v0  ;;  %v1146_v28 = vadd.f32 %v1251_v19, %v1145_v25  ;;  %v1462_v29 = vpop.f32.mrb[15].mxu1 }
 0x4a5   :  { %v1154_v30 = vmul.f32 %v1153_v24, %v1151_v27  ;;  %v1152_v31 = vadd.f32 %v1150_v26, %v1146_v28 }
 0x4a7   :  { %v1155_v32 = vmul.f32 %v1153_v24, %v1152_v31  ;;  %v1156_v17 = vadd.f32 %v1154_v30, %v2097_v14 }
 0x4a9   :  { %v1157_v18 = vadd.f32 %v1155_v32, %v2099_v16  ;;  %1158 = vst [vmem:[#allocation20] sm:$0xff] %v1156_v17 }
 0x4ab   :  { %1159 = vst [vmem:[#allocation20 + $0x8] sm:$0xff] %v1157_v18 }
 0x4ac   :  { %1803 = shalt.err (!%p1800_p0)
}
 0x4ad   :  { %s2227_s27 = sld [smem:[#allocation29_spill]] }
 0x4b3   :  { %s1804_s28 = scalar_lea.hbm %s2227_s27, 256 }
 0x4b4   :  { %p1805_p1 = scmp.ne.s32.totalorder %s2227_s27, %s1804_s28  ;;  %p1808_p2 = scmp.lt.u32.totalorder %s1804_s28, %s2227_s27 }
 0x4b6   :  { %p1810_p3 = pnand %p1808_p2, %p1805_p1 }
 0x4b8   :  { %1813 = shalt.err (!%p1810_p3)
}
 0x4b9   :  { %1171 = dma.vmem_to_hbm [thread:$0]  %s1166_s15, 256, %s2227_s27, [#allocation5], %s1829_s0, %s1829_s0, %s1830_s17  }
 0x4ba   :  { %1826 = dma.done.wait [#allocation5], 256  }
 0x4bb   :  { %1827 = vsyncadd [#allocation5], 4294967040 }
 0x4bc   :  { %1175 = vsyncpa [#allocation4], 1 }
 0x4bd   :  { %1176 = vsyncpa [#allocation7], 1 }
 0x4be   :  { %1177 = vsyncpa [#allocation10], 1 }
 0x4bf   :  { %1178 = vsyncpa [#allocation13], 1 }
 0x4c0   :  { %1179 = vsyncpa [#allocation16], 1 }
 0x4c1   :  { %1180 = vsyncpa [#allocation19], 1 }
 0x4c2   :  { %1181 = vsyncpa [#allocation5], 1 }

// kernel: tpu_custom_call.1
= control target key start
LH: loop header
LB: loop body
LE: loop exit
PB: predicated region body
PF: predicated region fallthrough
CT: control target
= control target key end

     0   :  { %s2206_s0 = inlined_call_operand.<no memory space> [shape: f32[1,1], index: 0, kind: input, shape index: {}]   ;;  %s2207_s1 = inlined_call_operand.hbm [shape: bf16[16,128], index: 1, kind: input, shape index: {}]   ;;  %s2208_s2 = inlined_call_operand.hbm [shape: f32[16,128], index: 2, kind: input, shape index: {}]   ;;  %s2209_s3 = inlined_call_operand.hbm [shape: bf16[128,128], index: 3, kind: input, shape index: {}]   ;;  %s2210_s4 = inlined_call_operand.hbm [shape: bf16[128,128], index: 4, kind: input, shape index: {}]   ;;  %s2211_s5 = inlined_call_operand.vmem [shape: f32[1,128], index: 5, kind: input, shape index: {}]   ;;  %s2212_s6 = inlined_call_operand.hbm [shape: bf16[128,128], index: 6, kind: input, shape index: {}]   ;;  %s2213_s7 = inlined_call_operand.vmem [shape: f32[1,128], index: 7, kind: input, shape index: {}]   ;;  %s2214_s8 = inlined_call_operand.hbm [shape: bf16[128,128], index: 8, kind: input, shape index: {}]   ;;  %s2215_s9 = inlined_call_operand.hbm [shape: bf16[128,128], index: 9, kind: input, shape index: {}]   ;;  %s2216_s10 = inlined_call_operand.hbm [shape: bf16[128,256], index: 10, kind: input, shape index: {}]   ;;  %s2217_s11 = inlined_call_operand.vmem [shape: f32[1,256], index: 11, kind: input, shape index: {}]   ;;  %s2218_s12 = inlined_call_operand.hbm [shape: bf16[128,128], index: 12, kind: input, shape index: {}]   ;;  %s2219_s13 = inlined_call_operand.vmem [shape: f32[1,128], index: 13, kind: input, shape index: {}]   ;;  %s2220_s14 = inlined_call_operand.hbm [shape: bf16[128,128], index: 14, kind: input, shape index: {}]   ;;  %s2221_s15 = inlined_call_operand.vmem [shape: f32[1,128], index: 15, kind: input, shape index: {}]   ;;  %s2222_s16 = inlined_call_operand.hbm [shape: f32[16,128], index: 16, kind: output, shape index: {}]  }
   0x1   :  { %2224 = sst [smem:[#allocation28_spill]] %s2206_s0 }
   0x2   :  { %2225 = sst [smem:[#allocation29_spill]] %s2222_s16 }
   0x3   :  { %22 = vsyncpa [#allocation4], 0 }
   0x4   :  { %23 = vsyncpa [#allocation7], 0 }
   0x5   :  { %24 = vsyncpa [#allocation10], 0 }
   0x6   :  { %25 = vsyncpa [#allocation13], 0 }
   0x7   :  { %26 = vsyncpa [#allocation16], 0 }
   0x8   :  { %27 = vsyncpa [#allocation19], 0 }
   0x9   :  { %28 = vsyncpa [#allocation5], 0  ;;  %s1828_s21 = smov [#allocation6]   ;;  %s1572_s25 = scalar_lea.hbm %s2208_s2, 256 }
   0xa   :  { %s48_s22 = sshll.u32 %s1828_s21, 4  ;;  %p1573_p0 = scmp.ne.s32.totalorder %s2208_s2, %s1572_s25  ;;  %s49_s22 = int_to_ptr.vmem [resolvable:$true] %s48_s22 }
   0xb   :  { %p1576_p1 = scmp.lt.u32.totalorder %s1572_s25, %s2208_s2 }
   0xd   :  { %p1578_p2 = pnand %p1576_p1, %p1573_p0 }
   0xf   :  { %1581 = shalt.err (!%p1578_p2)
}
  0x10   :  { %s1582_s30 = scalar_lea.vmem %s49_s22, 256  ;;  %p1587_p4 = scmp.lt.s32.totalorder %s49_s22, %s49_s22 }
  0x11   :  { %p1583_p3 = scmp.ne.s32.totalorder %s49_s22, %s1582_s30  ;;  %p1588_p5 = scmp.lt.s32.totalorder %s1582_s30, %s1582_s30 }
  0x13   :  { %p1589_p6 = por %p1588_p5, %p1587_p4 }
  0x15   :  { %p1590_p7 = pnand %p1589_p6, %p1583_p3 }
  0x17   :  { %1593 = shalt.err (!%p1590_p7)
}
  0x18   :  { %s1829_s0 = smov 128   ;;  %s1830_s17 = smov 8  }
  0x19   :  { %54 = dma.hbm_to_vmem [thread:$0]  %s2208_s2, 256, %s49_s22, [#allocation7], %s1829_s0, %s1829_s0, %s1830_s17  }
  0x1a   :  { %s1831_s20 = smov [#allocation9]   ;;  %s1832_s23 = smov [#allocation12]  }
  0x1b   :  { %s72_s21 = sshll.u32 %s1831_s20, 4  ;;  %s100_s24 = sshll.u32 %s1832_s23, 4  ;;  %s73_s21 = int_to_ptr.vmem [resolvable:$true] %s72_s21  ;;  %s101_s24 = int_to_ptr.vmem [resolvable:$true] %s100_s24 }
  0x1c   :  { %s1594_s27 = scalar_lea.hbm %s2210_s4, 1024 }
  0x1d   :  { %p1595_p8 = scmp.ne.s32.totalorder %s2210_s4, %s1594_s27  ;;  %p1598_p9 = scmp.lt.u32.totalorder %s1594_s27, %s2210_s4 }
  0x1f   :  { %p1600_p10 = pnand %p1598_p9, %p1595_p8 }
  0x21   :  { %1603 = shalt.err (!%p1600_p10)
}
  0x22   :  { %s1604_s2 = scalar_lea.vmem %s73_s21, 1024  ;;  %p1609_p12 = scmp.lt.s32.totalorder %s73_s21, %s73_s21 }
  0x23   :  { %p1605_p11 = scmp.ne.s32.totalorder %s73_s21, %s1604_s2  ;;  %p1610_p13 = scmp.lt.s32.totalorder %s1604_s2, %s1604_s2 }
  0x25   :  { %p1611_p0 = por %p1610_p13, %p1609_p12 }
  0x27   :  { %p1612_p1 = pnand %p1611_p0, %p1605_p11 }
  0x29   :  { %1615 = shalt.err (!%p1612_p1)
}
  0x2a   :  { %s1833_s22 = smov 64   ;;  %s1834_s18 = smov 4  }
  0x2b   :  { %78 = dma.hbm_to_vmem [thread:$0]  %s2210_s4, 1024, %s73_s21, [#allocation10], %s1833_s22, %s1833_s22, %s1834_s18  }
  0x2c   :  { %s1616_s25 = scalar_lea.hbm %s2214_s8, 1024 }
  0x2d   :  { %p1617_p2 = scmp.ne.s32.totalorder %s2214_s8, %s1616_s25  ;;  %p1620_p3 = scmp.lt.u32.totalorder %s1616_s25, %s2214_s8 }
  0x2f   :  { %p1622_p4 = pnand %p1620_p3, %p1617_p2 }
  0x31   :  { %1625 = shalt.err (!%p1622_p4)
}
  0x32   :  { %s1626_s30 = scalar_lea.vmem %s101_s24, 1024  ;;  %p1631_p6 = scmp.lt.s32.totalorder %s101_s24, %s101_s24 }
  0x33   :  { %p1627_p5 = scmp.ne.s32.totalorder %s101_s24, %s1626_s30  ;;  %p1632_p7 = scmp.lt.s32.totalorder %s1626_s30, %s1626_s30 }
  0x35   :  { %p1633_p8 = por %p1632_p7, %p1631_p6 }
  0x37   :  { %p1634_p9 = pnand %p1633_p8, %p1627_p5 }
  0x39   :  { %1637 = shalt.err (!%p1634_p9)
}
  0x3a   :  { %106 = dma.hbm_to_vmem [thread:$0]  %s2214_s8, 1024, %s101_s24, [#allocation13], %s1833_s22, %s1833_s22, %s1834_s18  }
  0x3b   :  { %s1835_s2 = smov [#allocation15]   ;;  %s1836_s20 = smov [#allocation3]  }
  0x3c   :  { %s124_s19 = sshll.u32 %s1835_s2, 4  ;;  %s36_s16 = sshll.u32 %s1836_s20, 4  ;;  %s125_s19 = int_to_ptr.vmem [resolvable:$true] %s124_s19  ;;  %s37_s16 = int_to_ptr.vmem [resolvable:$true] %s36_s16 }
  0x3d   :  { %s1638_s26 = scalar_lea.hbm %s2216_s10, 2048 }
  0x3e   :  { %p1639_p10 = scmp.ne.s32.totalorder %s2216_s10, %s1638_s26  ;;  %p1642_p11 = scmp.lt.u32.totalorder %s1638_s26, %s2216_s10 }
  0x40   :  { %p1644_p12 = pnand %p1642_p11, %p1639_p10 }
  0x42   :  { %1647 = shalt.err (!%p1644_p12)
}
  0x43   :  { %s1648_s8 = scalar_lea.vmem %s125_s19, 2048  ;;  %p1653_p0 = scmp.lt.s32.totalorder %s125_s19, %s125_s19 }
  0x44   :  { %p1649_p13 = scmp.ne.s32.totalorder %s125_s19, %s1648_s8  ;;  %p1654_p1 = scmp.lt.s32.totalorder %s1648_s8, %s1648_s8 }
  0x46   :  { %p1655_p2 = por %p1654_p1, %p1653_p0 }
  0x48   :  { %p1656_p3 = pnand %p1655_p2, %p1649_p13 }
  0x4a   :  { %1659 = shalt.err (!%p1656_p3)
}
  0x4b   :  { %130 = dma.hbm_to_vmem [thread:$0]  %s2216_s10, 2048, %s125_s19, [#allocation16], %s1829_s0, %s1829_s0, %s1830_s17  }
  0x4c   :  { %s1660_s20 = scalar_lea.hbm %s2207_s1, 128 }
  0x4d   :  { %p1661_p4 = scmp.ne.s32.totalorder %s2207_s1, %s1660_s20  ;;  %p1664_p5 = scmp.lt.u32.totalorder %s1660_s20, %s2207_s1 }
  0x4f   :  { %p1666_p6 = pnand %p1664_p5, %p1661_p4 }
  0x51   :  { %1669 = shalt.err (!%p1666_p6)
}
  0x52   :  { %s1670_s28 = scalar_lea.vmem %s37_s16, 128  ;;  %p1675_p8 = scmp.lt.s32.totalorder %s37_s16, %s37_s16 }
  0x53   :  { %p1671_p7 = scmp.ne.s32.totalorder %s37_s16, %s1670_s28  ;;  %p1676_p9 = scmp.lt.s32.totalorder %s1670_s28, %s1670_s28 }
  0x55   :  { %p1677_p10 = por %p1676_p9, %p1675_p8 }
  0x57   :  { %p1678_p11 = pnand %p1677_p10, %p1671_p7 }
  0x59   :  { %1681 = shalt.err (!%p1678_p11)
}
  0x5a   :  { %42 = dma.hbm_to_vmem [thread:$0]  %s2207_s1, 128, %s37_s16, [#allocation4], %s1833_s22, %s1833_s22, %s1834_s18  }
  0x5b   :  { %s1837_s29 = smov [#allocation8]   ;;  %s1838_s8 = smov [#allocation11]  }
  0x5c   :  { %s60_s30 = sshll.u32 %s1837_s29, 4  ;;  %s86_s24 = sshll.u32 %s1838_s8, 4  ;;  %s61_s30 = int_to_ptr.vmem [resolvable:$true] %s60_s30  ;;  %s87_s24 = int_to_ptr.vmem [resolvable:$true] %s86_s24 }
  0x5d   :  { %s1682_s2 = scalar_lea.hbm %s2209_s3, 1024 }
  0x5e   :  { %p1683_p12 = scmp.ne.s32.totalorder %s2209_s3, %s1682_s2  ;;  %p1686_p13 = scmp.lt.u32.totalorder %s1682_s2, %s2209_s3 }
  0x60   :  { %p1688_p0 = pnand %p1686_p13, %p1683_p12 }
  0x62   :  { %1691 = shalt.err (!%p1688_p0)
}
  0x63   :  { %s1692_s1 = scalar_lea.vmem %s61_s30, 1024  ;;  %p1697_p2 = scmp.lt.s32.totalorder %s61_s30, %s61_s30 }
  0x64   :  { %p1693_p1 = scmp.ne.s32.totalorder %s61_s30, %s1692_s1  ;;  %p1698_p3 = scmp.lt.s32.totalorder %s1692_s1, %s1692_s1 }
  0x66   :  { %p1699_p4 = por %p1698_p3, %p1697_p2 }
  0x68   :  { %p1700_p5 = pnand %p1699_p4, %p1693_p1 }
  0x6a   :  { %1703 = shalt.err (!%p1700_p5)
}
  0x6b   :  { %66 = dma.hbm_to_vmem [thread:$0]  %s2209_s3, 1024, %s61_s30, [#allocation7], %s1833_s22, %s1833_s22, %s1834_s18  }
  0x6c   :  { %s1704_s19 = scalar_lea.hbm %s2212_s6, 1024 }
  0x6d   :  { %p1705_p6 = scmp.ne.s32.totalorder %s2212_s6, %s1704_s19  ;;  %p1708_p7 = scmp.lt.u32.totalorder %s1704_s19, %s2212_s6 }
  0x6f   :  { %p1710_p8 = pnand %p1708_p7, %p1705_p6 }
  0x71   :  { %1713 = shalt.err (!%p1710_p8)
}
  0x72   :  { %s1714_s2 = scalar_lea.vmem %s87_s24, 1024  ;;  %p1719_p10 = scmp.lt.s32.totalorder %s87_s24, %s87_s24 }
  0x73   :  { %p1715_p9 = scmp.ne.s32.totalorder %s87_s24, %s1714_s2  ;;  %p1720_p11 = scmp.lt.s32.totalorder %s1714_s2, %s1714_s2 }
  0x75   :  { %p1721_p12 = por %p1720_p11, %p1719_p10 }
  0x77   :  { %p1722_p13 = pnand %p1721_p12, %p1715_p9 }
  0x79   :  { %1725 = shalt.err (!%p1722_p13)
}
  0x7a   :  { %92 = dma.hbm_to_vmem [thread:$0]  %s2212_s6, 1024, %s87_s24, [#allocation10], %s1833_s22, %s1833_s22, %s1834_s18  }
  0x7b   :  { %s1839_s20 = smov [#allocation14]   ;;  %s1840_s25 = smov [#allocation17]  }
  0x7c   :  { %s112_s23 = sshll.u32 %s1839_s20, 4  ;;  %s138_s26 = sshll.u32 %s1840_s25, 4  ;;  %s113_s23 = int_to_ptr.vmem [resolvable:$true] %s112_s23  ;;  %s139_s26 = int_to_ptr.vmem [resolvable:$true] %s138_s26 }
  0x7d   :  { %s1726_s27 = scalar_lea.hbm %s2215_s9, 1024 }
  0x7e   :  { %p1727_p0 = scmp.ne.s32.totalorder %s2215_s9, %s1726_s27  ;;  %p1730_p1 = scmp.lt.u32.totalorder %s1726_s27, %s2215_s9 }
  0x80   :  { %p1732_p2 = pnand %p1730_p1, %p1727_p0 }
  0x82   :  { %1735 = shalt.err (!%p1732_p2)
}
  0x83   :  { %s1736_s6 = scalar_lea.vmem %s113_s23, 1024  ;;  %p1741_p4 = scmp.lt.s32.totalorder %s113_s23, %s113_s23 }
  0x84   :  { %p1737_p3 = scmp.ne.s32.totalorder %s113_s23, %s1736_s6  ;;  %p1742_p5 = scmp.lt.s32.totalorder %s1736_s6, %s1736_s6 }
  0x86   :  { %p1743_p6 = por %p1742_p5, %p1741_p4 }
  0x88   :  { %p1744_p7 = pnand %p1743_p6, %p1737_p3 }
  0x8a   :  { %1747 = shalt.err (!%p1744_p7)
}
  0x8b   :  { %118 = dma.hbm_to_vmem [thread:$0]  %s2215_s9, 1024, %s113_s23, [#allocation13], %s1833_s22, %s1833_s22, %s1834_s18  }
  0x8c   :  { %s1748_s2 = scalar_lea.hbm %s2218_s12, 1024 }
  0x8d   :  { %p1749_p8 = scmp.ne.s32.totalorder %s2218_s12, %s1748_s2  ;;  %p1752_p9 = scmp.lt.u32.totalorder %s1748_s2, %s2218_s12 }
  0x8f   :  { %p1754_p10 = pnand %p1752_p9, %p1749_p8 }
  0x91   :  { %1757 = shalt.err (!%p1754_p10)
}
  0x92   :  { %s1758_s1 = scalar_lea.vmem %s139_s26, 1024  ;;  %p1763_p12 = scmp.lt.s32.totalorder %s139_s26, %s139_s26 }
  0x93   :  { %p1759_p11 = scmp.ne.s32.totalorder %s139_s26, %s1758_s1  ;;  %p1764_p13 = scmp.lt.s32.totalorder %s1758_s1, %s1758_s1 }
  0x95   :  { %p1765_p0 = por %p1764_p13, %p1763_p12 }
  0x97   :  { %p1766_p1 = pnand %p1765_p0, %p1759_p11 }
  0x99   :  { %1769 = shalt.err (!%p1766_p1)
}
  0x9a   :  { %144 = dma.hbm_to_vmem [thread:$0]  %s2218_s12, 1024, %s139_s26, [#allocation16], %s1833_s22, %s1833_s22, %s1834_s18  }
  0x9b   :  { %s1841_s16 = smov [#allocation18]   ;;  %s1770_s19 = scalar_lea.hbm %s2220_s14, 1024 }
  0x9c   :  { %s152_s27 = sshll.u32 %s1841_s16, 4  ;;  %p1771_p2 = scmp.ne.s32.totalorder %s2220_s14, %s1770_s19  ;;  %s153_s27 = int_to_ptr.vmem [resolvable:$true] %s152_s27 }
  0x9d   :  { %p1774_p3 = scmp.lt.u32.totalorder %s1770_s19, %s2220_s14 }
  0x9f   :  { %p1776_p4 = pnand %p1774_p3, %p1771_p2 }
  0xa1   :  { %1779 = shalt.err (!%p1776_p4)
}
  0xa2   :  { %s1780_s4 = scalar_lea.vmem %s153_s27, 1024  ;;  %p1785_p6 = scmp.lt.s32.totalorder %s153_s27, %s153_s27 }
  0xa3   :  { %p1781_p5 = scmp.ne.s32.totalorder %s153_s27, %s1780_s4  ;;  %p1786_p7 = scmp.lt.s32.totalorder %s1780_s4, %s1780_s4 }
  0xa5   :  { %p1787_p8 = por %p1786_p7, %p1785_p6 }
  0xa7   :  { %p1788_p9 = pnand %p1787_p8, %p1781_p5 }
  0xa9   :  { %1791 = shalt.err (!%p1788_p9)
}
  0xaa   :  { %158 = dma.hbm_to_vmem [thread:$0]  %s2220_s14, 1024, %s153_s27, [#allocation19], %s1833_s22, %s1833_s22, %s1834_s18  }
  0xab   :  { %1814 = dma.done.wait [#allocation4], 128  }
  0xac   :  { %1815 = vsyncadd [#allocation4], 4294967168 }
  0xad   :  { %1816 = dma.done.wait [#allocation7], 1280  }
  0xae   :  { %1817 = vsyncadd [#allocation7], 4294966016 }
  0xaf   :  { %1818 = dma.done.wait [#allocation10], 2048  }
  0xb0   :  { %1819 = vsyncadd [#allocation10], 4294965248 }
  0xb1   :  { %1820 = dma.done.wait [#allocation13], 2048  }
  0xb2   :  { %1821 = vsyncadd [#allocation13], 4294965248 }
  0xb3   :  { %1822 = dma.done.wait [#allocation16], 3072  }
  0xb4   :  { %1823 = vsyncadd [#allocation16], 4294964224 }
  0xb5   :  { %1824 = dma.done.wait [#allocation19], 1024  }
  0xb6   :  { %1825 = vsyncadd [#allocation19], 4294966272  ;;  %v1842_v0 = vmov 0.0   ;;  %vm1843_vm0 = vmmov 0   ;;  %v1491_v1 = vld [vmem:[#allocation9] sm:$0xff]   ;;  %v1493_v3 = vld [vmem:[#allocation9 + $0x8] sm:$0xff]  }
  0xb7   :  { %1323 = vmatprep.subr.bf16.mxu0 %v1842_v0  ;;  %1343 = vmatprep.subr.bf16.mxu1 %v1842_v0  ;;  %v1492_v2 = vld [vmem:[#allocation8] sm:$0xff]   ;;  %v1494_v4 = vld [vmem:[#allocation8 + $0x8] sm:$0xff]   ;;  %v1495_v5 = vld [vmem:[#allocation9 + $0x10] sm:$0xff]   ;;  %v1844_v22 = vmov 0   ;;  %s2226_s1 = sld [smem:[#allocation28_spill]] }
  0xb8   :  { %1339 = vmatprep.mubr.msk.bf16.mxu0 %vm1843_vm0, %v1842_v0  ;;  %1359 = vmatprep.mubr.msk.bf16.mxu1 %vm1843_vm0, %v1842_v0  ;;  %v1496_v6 = vld [vmem:[#allocation8 + $0x10] sm:$0xff]   ;;  %v1497_v7 = vld [vmem:[#allocation9 + $0x18] sm:$0xff]   ;;  %v1499_v9 = vld [vmem:[#allocation9 + $0x20] sm:$0xff]  }
  0xb9   :  { %1324 = vmatpush3.bf16.msra.mxu0 %v1491_v1  ;;  %1344 = vmatpush3.bf16.msra.mxu1 %v1492_v2  ;;  %v1498_v8 = vld [vmem:[#allocation8 + $0x18] sm:$0xff]   ;;  %v1500_v10 = vld [vmem:[#allocation8 + $0x20] sm:$0xff]   ;;  %v1501_v11 = vld [vmem:[#allocation9 + $0x28] sm:$0xff]  }
  0xba   :  { %1325 = vmatprep.subr.bf16.mxu0 %v1842_v0  ;;  %1345 = vmatprep.subr.bf16.mxu1 %v1842_v0  ;;  %v1502_v12 = vld [vmem:[#allocation8 + $0x28] sm:$0xff]   ;;  %v1503_v13 = vld [vmem:[#allocation9 + $0x30] sm:$0xff]   ;;  %v2099_v16 = vld [vmem:[#allocation6 + $0x8] sm:$0xff] }
  0xbb   :  { %v2097_v14 = vld [vmem:[#allocation6] sm:$0xff]  ;;  %v2101_v17 = vld [vmem:[#allocation3] sm:$0xf]  ;;  %v2104_v18 = vld [vmem:[#allocation3 + $0x4] sm:$0xf] }
  0xbc   :  { %v1504_v15 = vld [vmem:[#allocation8 + $0x30] sm:$0xff]   ;;  %v1505_v19 = vld [vmem:[#allocation9 + $0x38] sm:$0xff]   ;;  %v2109_v21 = vpack.c.bf16 %v2099_v16, %v2097_v14  ;;  %v198_v23 = vmax.bf16 %v1844_v22, %v2101_v17  ;;  %v199_v24 = vmax.bf16 %v1844_v22, %v2104_v18  ;;  %v1507_v25 = vld [vmem:[#allocation11] sm:$0xff]  }
  0xbd   :  { %1326 = vmatpush3.bf16.msra.mxu0 %v1493_v3  ;;  %1346 = vmatpush3.bf16.msra.mxu1 %v1494_v4  ;;  %v1506_v20 = vld [vmem:[#allocation8 + $0x38] sm:$0xff]   ;;  %v1508_v28 = vld [vmem:[#allocation11 + $0x8] sm:$0xff]   ;;  %v1509_v29 = vld [vmem:[#allocation11 + $0x10] sm:$0xff]  }
  0xbe   :  { %1327 = vmatprep.subr.bf16.mxu0 %v1842_v0  ;;  %1347 = vmatprep.subr.bf16.mxu1 %v1842_v0  ;;  %v216_v26 = vmax.bf16 %v1844_v22, %v2109_v21  ;;  %v1190_v27 = vcombine.low %v198_v23, %v199_v24  ;;  %v1510_v30 = vld [vmem:[#allocation11 + $0x18] sm:$0xff]   ;;  %v1511_v31 = vld [vmem:[#allocation11 + $0x20] sm:$0xff]   ;;  %v1512_v32 = vld [vmem:[#allocation11 + $0x28] sm:$0xff]  }
  0xbf   :  { %v1513_v33 = vld [vmem:[#allocation11 + $0x30] sm:$0xff]   ;;  %v1514_v34 = vld [vmem:[#allocation11 + $0x38] sm:$0xff]   ;;  %v1532_v35 = vld [vmem:[#allocation15] ss:$8 sps:$4 sm:$0xff]  }
  0xc0   :  { %v1534_v36 = vld [vmem:[#allocation15 + $0x4] ss:$8 sps:$4 sm:$0xff]   ;;  %v1537_v37 = vld [vmem:[#allocation15 + $0x14] ss:$8 sps:$4 sm:$0xff]   ;;  %v1535_v38 = vld [vmem:[#allocation15 + $0x10] ss:$8 sps:$4 sm:$0xff]  }
  0xc1   :  { %1328 = vmatpush3.bf16.msra.mxu0 %v1495_v5  ;;  %1348 = vmatpush3.bf16.msra.mxu1 %v1496_v6  ;;  %v1540_v39 = vld [vmem:[#allocation15 + $0x24] ss:$8 sps:$4 sm:$0xff]   ;;  %v1538_v40 = vld [vmem:[#allocation15 + $0x20] ss:$8 sps:$4 sm:$0xff]   ;;  %v1543_v41 = vld [vmem:[#allocation15 + $0x34] ss:$8 sps:$4 sm:$0xff]  }
  0xc2   :  { %1329 = vmatprep.subr.bf16.mxu0 %v1842_v0  ;;  %1349 = vmatprep.subr.bf16.mxu1 %v1842_v0  ;;  %v1541_v42 = vld [vmem:[#allocation15 + $0x30] ss:$8 sps:$4 sm:$0xff]   ;;  %v1546_v43 = vld [vmem:[#allocation15 + $0x44] ss:$8 sps:$4 sm:$0xff]   ;;  %v1544_v44 = vld [vmem:[#allocation15 + $0x40] ss:$8 sps:$4 sm:$0xff]  }
  0xc3   :  { %v1549_v45 = vld [vmem:[#allocation15 + $0x54] ss:$8 sps:$4 sm:$0xff]   ;;  %v1547_v46 = vld [vmem:[#allocation15 + $0x50] ss:$8 sps:$4 sm:$0xff]   ;;  %v1552_v47 = vld [vmem:[#allocation15 + $0x64] ss:$8 sps:$4 sm:$0xff]  }
  0xc4   :  { %v1550_v48 = vld [vmem:[#allocation15 + $0x60] ss:$8 sps:$4 sm:$0xff]   ;;  %v1517_v4 = vld [vmem:[#allocation14 + $0x10] sm:$0xff]   ;;  %v1518_v5 = vld [vmem:[#allocation14 + $0x18] sm:$0xff]  }
  0xc5   :  { %1330 = vmatpush3.bf16.msra.mxu0 %v1497_v7  ;;  %1350 = vmatpush3.bf16.msra.mxu1 %v1498_v8  ;;  %v1199_v51 = vld [vmem:[%s2211_s5] ss:$0 sm:$0xff]  ;;  %v1515_v1 = vld [vmem:[#allocation14] sm:$0xff]   ;;  %v1521_v8 = vld [vmem:[#allocation14 + $0x30] sm:$0xff]  }
  0xc6   :  { %1331 = vmatprep.subr.bf16.mxu0 %v1842_v0  ;;  %1351 = vmatprep.subr.bf16.mxu1 %v1842_v0  ;;  %v1516_v3 = vld [vmem:[#allocation14 + $0x8] sm:$0xff]   ;;  %v1519_v6 = vld [vmem:[#allocation14 + $0x20] sm:$0xff]   ;;  %v1555_v23 = vld [vmem:[#allocation15 + $0x74] ss:$8 sps:$4 sm:$0xff]  }
  0xc7   :  { %v1520_v7 = vld [vmem:[#allocation14 + $0x28] sm:$0xff]   ;;  %v1553_v24 = vld [vmem:[#allocation15 + $0x70] ss:$8 sps:$4 sm:$0xff]  }
  0xc9   :  { %1332 = vmatpush3.bf16.msra.mxu0 %v1499_v9  ;;  %1352 = vmatpush3.bf16.msra.mxu1 %v1500_v10  ;;  %v1522_v9 = vld [vmem:[#allocation14 + $0x38] sm:$0xff]   ;;  %v1523_v10 = vld [vmem:[#allocation12] sm:$0xff]  }
  0xca   :  { %1333 = vmatprep.subr.bf16.mxu0 %v1842_v0  ;;  %1353 = vmatprep.subr.bf16.mxu1 %v1842_v0 }
  0xcd   :  { %1334 = vmatpush3.bf16.msra.mxu0 %v1501_v11  ;;  %1354 = vmatpush3.bf16.msra.mxu1 %v1502_v12  ;;  %v1524_v11 = vld [vmem:[#allocation12 + $0x8] sm:$0xff]   ;;  %v1525_v12 = vld [vmem:[#allocation12 + $0x10] sm:$0xff]  }
  0xce   :  { %1335 = vmatprep.subr.bf16.mxu0 %v1842_v0  ;;  %1355 = vmatprep.subr.bf16.mxu1 %v1842_v0 }
  0xd1   :  { %1336 = vmatpush3.bf16.msra.mxu0 %v1503_v13  ;;  %1356 = vmatpush3.bf16.msra.mxu1 %v1504_v15  ;;  %v1526_v13 = vld [vmem:[#allocation12 + $0x18] sm:$0xff]   ;;  %v1527_v15 = vld [vmem:[#allocation12 + $0x20] sm:$0xff]  }
  0xd2   :  { %1337 = vmatprep.subr.bf16.mxu0 %v1842_v0  ;;  %1357 = vmatprep.subr.bf16.mxu1 %v1842_v0 }
  0xd5   :  { %1338 = vmatpush3.bf16.msra.mxu0 %v1505_v19  ;;  %1358 = vmatpush3.bf16.msra.mxu1 %v1506_v20  ;;  %v1528_v19 = vld [vmem:[#allocation12 + $0x28] sm:$0xff]   ;;  %v1529_v20 = vld [vmem:[#allocation12 + $0x30] sm:$0xff]  }
  0xd6   :  { %1363 = vmatprep.subr.bf16.mxu0 %v1842_v0  ;;  %868 = vmatprep.subr.bf16.mxu1 %v1534_v36  ;;  %v1561_v36 = vld [vmem:[#allocation17 + $0x28] sm:$0xff]  }
  0xd8   :  { %1340 = vmatmul.mubr.bf16.vlgmr.msra.gmra.mrb[0].mxu0 %v216_v26  ;;  %1360 = vmatmul.mubr.bf16.vlgmr.msra.gmra.mrb[0].mxu1 %v1190_v27 }
  0xd9   :  { %1364 = vmatpush3.bf16.msra.mxu0 %v1507_v25  ;;  %1379 = vmatprep.mubr.msk.bf16.mxu0 %vm1843_vm0, %v1842_v0  ;;  %v1200_v25 = vld [vmem:[%s2213_s7] ss:$0 sm:$0xff] }
  0xda   :  { %1365 = vmatprep.subr.bf16.mxu0 %v1842_v0  ;;  %900 = vmatprep.mubr.bf16.mxu1 %v1844_v22  ;;  %v1217_v22 = vcombine.low %v2101_v17, %v2104_v18  ;;  %v1557_v18 = vld [vmem:[#allocation17 + $0x8] sm:$0xff]  }
  0xdb   :  { %869 = vmatpush1.bf16.msra.mxu1 %v1532_v35  ;;  %v1560_v35 = vld [vmem:[#allocation17 + $0x20] sm:$0xff]  }
  0xdc   :  { %870 = vmatprep.subr.bf16.mxu1 %v1537_v37  ;;  %v1562_v37 = vld [vmem:[#allocation17 + $0x30] sm:$0xff]  }
  0xdd   :  { %1366 = vmatpush3.bf16.msra.mxu0 %v1508_v28 }
  0xde   :  { %1367 = vmatprep.subr.bf16.mxu0 %v1842_v0 }
  0xdf   :  { %871 = vmatpush1.bf16.msra.mxu1 %v1535_v38  ;;  %v1563_v38 = vld [vmem:[#allocation17 + $0x38] sm:$0xff]  }
  0xe0   :  { %872 = vmatprep.subr.bf16.mxu1 %v1540_v39  ;;  %v778_v39 = vlaneseq }
  0xe1   :  { %1368 = vmatpush3.bf16.msra.mxu0 %v1509_v29 }
  0xe2   :  { %1369 = vmatprep.subr.bf16.mxu0 %v1842_v0 }
  0xe3   :  { %873 = vmatpush1.bf16.msra.mxu1 %v1538_v40  ;;  %v779_v40 = vshrl.u32 %v778_v39, 7 }
  0xe4   :  { %874 = vmatprep.subr.bf16.mxu1 %v1543_v41 }
  0xe5   :  { %1370 = vmatpush3.bf16.msra.mxu0 %v1510_v30  ;;  %v780_v41 = vsub.s32 0, %v779_v40 }
  0xe6   :  { %1371 = vmatprep.subr.bf16.mxu0 %v1842_v0 }
  0xe7   :  { %875 = vmatpush1.bf16.msra.mxu1 %v1541_v42  ;;  %v776_v42 = vld [vmem:[%s2217_s11] sm:$0x3] }
  0xe8   :  { %876 = vmatprep.subr.bf16.mxu1 %v1546_v43  ;;  %v784_v43 = vsub.s32 1, %v779_v40 }
  0xe9   :  { %1372 = vmatpush3.bf16.msra.mxu0 %v1511_v31 }
  0xea   :  { %1373 = vmatprep.subr.bf16.mxu0 %v1842_v0 }
  0xeb   :  { %877 = vmatpush1.bf16.msra.mxu1 %v1544_v44  ;;  %v781_v44 = vrot.slane %v776_v42, %v780_v41 }
  0xec   :  { %878 = vmatprep.subr.bf16.mxu1 %v1549_v45  ;;  %v785_v45 = vrot.slane %v776_v42, %v784_v43 }
  0xed   :  { %1374 = vmatpush3.bf16.msra.mxu0 %v1512_v32  ;;  %v1556_v32 = vld [vmem:[#allocation17] sm:$0xff]  }
  0xee   :  { %1375 = vmatprep.subr.bf16.mxu0 %v1842_v0 }
  0xef   :  { %879 = vmatpush1.bf16.msra.mxu1 %v1547_v46 }
  0xf0   :  { %880 = vmatprep.subr.bf16.mxu1 %v1552_v47 }
  0xf1   :  { %1376 = vmatpush3.bf16.msra.mxu0 %v1513_v33  ;;  %v1558_v33 = vld [vmem:[#allocation17 + $0x10] sm:$0xff]  }
  0xf2   :  { %1377 = vmatprep.subr.bf16.mxu0 %v1842_v0 }
  0xf3   :  { %881 = vmatpush1.bf16.msra.mxu1 %v1550_v48 }
  0xf4   :  { %882 = vmatprep.subr.bf16.mxu1 %v1555_v23 }
  0xf5   :  { %1378 = vmatpush3.bf16.msra.mxu0 %v1514_v34  ;;  %v1559_v34 = vld [vmem:[#allocation17 + $0x18] sm:$0xff]  }
  0xf6   :  { %1383 = vmatprep.subr.bf16.mxu0 %v1842_v0 }
  0xf7   :  { %883 = vmatpush1.bf16.msra.mxu1 %v1553_v24  ;;  %v1153_v24 = vstv %s2226_s1 }
  0xf8   :  { %1423 = vmatprep.subr.bf16.mxu1 %v1842_v0 }
 0x1ab   :  { %v315_v49 = vpop.f32.mrb[0].mxu0  ;;  %v410_v50 = vpop.f32.mrb[0].mxu1 }
 0x1ac   :  { %v1341_v52 = vpop.f32.mrb[1].mxu0  ;;  %v411_v53 = vadd.f32 %v410_v50, %v315_v49  ;;  %v1361_v54 = vpop.f32.mrb[1].mxu1 }
 0x1ad   :  { %v318_v55 = vpop.f32.mrb[2].mxu0  ;;  %v413_v56 = vpop.f32.mrb[2].mxu1 }
 0x1ae   :  { %v1342_v57 = vpop.f32.mrb[3].mxu0  ;;  %v424_v58 = vadd.f32 %v1199_v51, %v411_v53  ;;  %v414_v59 = vadd.f32 %v413_v56, %v318_v55  ;;  %v1362_v60 = vpop.f32.mrb[3].mxu1 }
 0x1af   :  { %v1564_v60 = vld [vmem:[#allocation18] sm:$0xff]  }
 0x1b0   :  { %v425_v61 = vadd.f32 %v1199_v51, %v414_v59  ;;  %v426_v62 = vmax.f32 %v424_v58, 0.0 }
 0x1b2   :  { %v427_v63 = vmax.f32 %v425_v61, 0.0 }
 0x1b4   :  { %v428_v2 = vpack.c.bf16 %v427_v63, %v426_v62 }
 0x1b6   :  { %1380 = vmatmul.mubr.bf16.vlgmr.msra.gmra.mrb[4].mxu0 %v428_v2  ;;  %v1565_v2 = vld [vmem:[#allocation18 + $0x8] sm:$0xff]  }
 0x1b7   :  { %1384 = vmatpush3.bf16.msra.mxu0 %v1515_v1  ;;  %1399 = vmatprep.mubr.msk.bf16.mxu0 %vm1843_vm0, %v1842_v0 }
 0x1b8   :  { %1385 = vmatprep.subr.bf16.mxu0 %v1842_v0 }
 0x1bb   :  { %1386 = vmatpush3.bf16.msra.mxu0 %v1516_v3  ;;  %v1566_v3 = vld [vmem:[#allocation18 + $0x10] sm:$0xff]  }
 0x1bc   :  { %1387 = vmatprep.subr.bf16.mxu0 %v1842_v0 }
 0x1bf   :  { %1388 = vmatpush3.bf16.msra.mxu0 %v1517_v4  ;;  %v1567_v4 = vld [vmem:[#allocation18 + $0x18] sm:$0xff]  }
 0x1c0   :  { %1389 = vmatprep.subr.bf16.mxu0 %v1842_v0 }
 0x1c3   :  { %1390 = vmatpush3.bf16.msra.mxu0 %v1518_v5  ;;  %v1568_v5 = vld [vmem:[#allocation18 + $0x20] sm:$0xff]  }
 0x1c4   :  { %1391 = vmatprep.subr.bf16.mxu0 %v1842_v0 }
 0x1c7   :  { %1392 = vmatpush3.bf16.msra.mxu0 %v1519_v6  ;;  %v1569_v6 = vld [vmem:[#allocation18 + $0x28] sm:$0xff]  }
 0x1c8   :  { %1393 = vmatprep.subr.bf16.mxu0 %v1842_v0 }
 0x1cb   :  { %1394 = vmatpush3.bf16.msra.mxu0 %v1520_v7  ;;  %v1570_v7 = vld [vmem:[#allocation18 + $0x30] sm:$0xff]  }
 0x1cc   :  { %1395 = vmatprep.subr.bf16.mxu0 %v1842_v0 }
 0x1cf   :  { %1396 = vmatpush3.bf16.msra.mxu0 %v1521_v8  ;;  %v1571_v8 = vld [vmem:[#allocation18 + $0x38] sm:$0xff]  }
 0x1d0   :  { %1397 = vmatprep.subr.bf16.mxu0 %v1842_v0 }
 0x1d3   :  { %1398 = vmatpush3.bf16.msra.mxu0 %v1522_v9 }
 0x1d4   :  { %1403 = vmatprep.subr.bf16.mxu0 %v1842_v0 }
 0x1d6   :  { %1400 = vmatmul.mubr.bf16.vlgmr.msra.gmra.mrb[4].mxu0 %v2109_v21  ;;  %v1530_v21 = vld [vmem:[#allocation12 + $0x38] sm:$0xff]  }
 0x1d7   :  { %1404 = vmatpush3.bf16.msra.mxu0 %v1523_v10  ;;  %1419 = vmatprep.mubr.msk.bf16.mxu0 %vm1843_vm0, %v1842_v0 }
 0x1d8   :  { %1405 = vmatprep.subr.bf16.mxu0 %v1842_v0 }
 0x1db   :  { %1406 = vmatpush3.bf16.msra.mxu0 %v1524_v11 }
 0x1dc   :  { %1407 = vmatprep.subr.bf16.mxu0 %v1842_v0 }
 0x1df   :  { %1408 = vmatpush3.bf16.msra.mxu0 %v1525_v12 }
 0x1e0   :  { %1409 = vmatprep.subr.bf16.mxu0 %v1842_v0 }
 0x1e3   :  { %1410 = vmatpush3.bf16.msra.mxu0 %v1526_v13  ;;  %v1242_v13 = vld [vmem:[%s2219_s13] ss:$0 sm:$0xff]  ;;  %s1845_s13 = smov [#allocation20]  }
 0x1e4   :  { %1411 = vmatprep.subr.bf16.mxu0 %v1842_v0 }
 0x1e7   :  { %1412 = vmatpush3.bf16.msra.mxu0 %v1527_v15 }
 0x1e8   :  { %1413 = vmatprep.subr.bf16.mxu0 %v1842_v0 }
 0x1eb   :  { %1414 = vmatpush3.bf16.msra.mxu0 %v1528_v19  ;;  %v1251_v19 = vld [vmem:[%s2221_s15] ss:$0 sm:$0xff]  ;;  %s1165_s15 = sshll.u32 %s1845_s13, 4  ;;  %s1166_s15 = int_to_ptr.vmem [resolvable:$true] %s1165_s15 }
 0x1ec   :  { %1415 = vmatprep.subr.bf16.mxu0 %v1842_v0  ;;  %s1792_s9 = scalar_lea.vmem %s1166_s15, 256  ;;  %p1797_p11 = scmp.lt.s32.totalorder %s1166_s15, %s1166_s15 }
 0x1ed   :  { %p1793_p10 = scmp.ne.s32.totalorder %s1166_s15, %s1792_s9  ;;  %p1798_p12 = scmp.lt.s32.totalorder %s1792_s9, %s1792_s9 }
 0x1ef   :  { %1416 = vmatpush3.bf16.msra.mxu0 %v1529_v20  ;;  %p1799_p13 = por %p1798_p12, %p1797_p11 }
 0x1f0   :  { %1417 = vmatprep.subr.bf16.mxu0 %v1842_v0 }
 0x1f1   :  { %p1800_p0 = pnand %p1799_p13, %p1793_p10 }
 0x1f3   :  { %1418 = vmatpush3.bf16.msra.mxu0 %v1530_v21 }
 0x1f6   :  { %1420 = vmatmul.mubr.bf16.vlgmr.msra.gmra.mrb[4].mxu0 %v1217_v22 }
 0x2c9   :  { %v750_v26 = vpop.f32.mrb[4].mxu0 }
 0x2ca   :  { %v1421_v27 = vpop.f32.mrb[5].mxu0  ;;  %v1463_v29 = vadd.f32 %v1200_v25, %v750_v26 }
 0x2cb   :  { %v753_v28 = vpop.f32.mrb[6].mxu0 }
 0x2cc   :  { %v1464_v30 = vadd.f32 %v1200_v25, %v753_v28  ;;  %v1422_v31 = vpop.f32.mrb[7].mxu0 }
 0x2ce   :  { %v759_v17 = vpack.c.bf16 %v1464_v30, %v1463_v29 }
 0x2d0   :  { %901 = vmatmul.mubr.bf16.vlgmr.msra.gmra.mrb[4].mxu1 %v759_v17 }
 0x2d1   :  { %1424 = vmatpush3.bf16.msra.mxu1 %v1556_v32  ;;  %1439 = vmatprep.mubr.msk.bf16.mxu1 %vm1843_vm0, %v1842_v0 }
 0x2d2   :  { %1425 = vmatprep.subr.bf16.mxu1 %v1842_v0 }
 0x2d5   :  { %1426 = vmatpush3.bf16.msra.mxu1 %v1557_v18 }
 0x2d6   :  { %1427 = vmatprep.subr.bf16.mxu1 %v1842_v0 }
 0x2d9   :  { %1428 = vmatpush3.bf16.msra.mxu1 %v1558_v33 }
 0x2da   :  { %1429 = vmatprep.subr.bf16.mxu1 %v1842_v0 }
 0x2dd   :  { %1430 = vmatpush3.bf16.msra.mxu1 %v1559_v34 }
 0x2de   :  { %1431 = vmatprep.subr.bf16.mxu1 %v1842_v0 }
 0x2e1   :  { %1432 = vmatpush3.bf16.msra.mxu1 %v1560_v35 }
 0x2e2   :  { %1433 = vmatprep.subr.bf16.mxu1 %v1842_v0 }
 0x2e5   :  { %1434 = vmatpush3.bf16.msra.mxu1 %v1561_v36 }
 0x2e6   :  { %1435 = vmatprep.subr.bf16.mxu1 %v1842_v0 }
 0x2e9   :  { %1436 = vmatpush3.bf16.msra.mxu1 %v1562_v37 }
 0x2ea   :  { %1437 = vmatprep.subr.bf16.mxu1 %v1842_v0 }
 0x2ed   :  { %1438 = vmatpush3.bf16.msra.mxu1 %v1563_v38 }
 0x2ee   :  { %1443 = vmatprep.subr.bf16.mxu1 %v1842_v0 }
 0x3a3   :  { %v902_v46 = vpop.f32.mrb[4].mxu1 }
 0x3a4   :  { %v903_v47 = vadd.f32 %v902_v46, %v781_v44  ;;  %v904_v48 = vpop.f32.mrb[5].mxu1 }
 0x3a5   :  { %v905_v49 = vadd.f32 %v904_v48, %v785_v45  ;;  %v906_v50 = vpop.f32.mrb[6].mxu1 }
 0x3a6   :  { %v915_v51 = vmul.f32 0.2, %v903_v47  ;;  %v907_v52 = vadd.f32 %v906_v50, %v781_v44  ;;  %v908_v53 = vpop.f32.mrb[7].mxu1  ;;  %vm911_vm1 = vcmp.gt.f32.partialorder %v903_v47, 0.0 }
 0x3a7   :  { %v916_v54 = vmul.f32 0.2, %v905_v49  ;;  %v909_v55 = vadd.f32 %v908_v53, %v785_v45  ;;  %vm912_vm2 = vcmp.gt.f32.partialorder %v905_v49, 0.0 }
 0x3a8   :  { %vm913_vm3 = vcmp.gt.f32.partialorder %v907_v52, 0.0  ;;  %v917_v56 = vmul.f32 0.2, %v907_v52  ;;  %v919_v58 = vsel %vm911_vm1, %v903_v47, %v915_v51 }
 0x3a9   :  { %vm914_vm4 = vcmp.gt.f32.partialorder %v909_v55, 0.0  ;;  %v918_v57 = vmul.f32 0.2, %v909_v55  ;;  %v920_v61 = vsel %vm912_vm2, %v905_v49, %v916_v54 }
 0x3aa   :  { %v921_v59 = vsel %vm913_vm3, %v907_v52, %v917_v56 }
 0x3ab   :  { %v923_v62 = vpack.c.bf16 %v921_v59, %v919_v58  ;;  %v922_v63 = vsel %vm914_vm4, %v909_v55, %v918_v57 }
 0x3ac   :  { %v924_v1 = vpack.c.bf16 %v922_v63, %v920_v61 }
 0x3ad   :  { %1440 = vmatmul.mubr.bf16.vlgmr.msra.gmra.mrb[8].mxu1 %v923_v62 }
 0x3ae   :  { %1444 = vmatpush3.bf16.msra.mxu1 %v1564_v60  ;;  %1459 = vmatprep.mubr.msk.bf16.mxu1 %vm1843_vm0, %v1842_v0 }
 0x3af   :  { %1445 = vmatprep.subr.bf16.mxu1 %v1842_v0 }
 0x3b2   :  { %1446 = vmatpush3.bf16.msra.mxu1 %v1565_v2 }
 0x3b3   :  { %1447 = vmatprep.subr.bf16.mxu1 %v1842_v0 }
 0x3b6   :  { %1448 = vmatpush3.bf16.msra.mxu1 %v1566_v3 }
 0x3b7   :  { %1449 = vmatprep.subr.bf16.mxu1 %v1842_v0 }
 0x3ba   :  { %1450 = vmatpush3.bf16.msra.mxu1 %v1567_v4 }
 0x3bb   :  { %1451 = vmatprep.subr.bf16.mxu1 %v1842_v0 }
 0x3be   :  { %1452 = vmatpush3.bf16.msra.mxu1 %v1568_v5 }
 0x3bf   :  { %1453 = vmatprep.subr.bf16.mxu1 %v1842_v0 }
 0x3c2   :  { %1454 = vmatpush3.bf16.msra.mxu1 %v1569_v6 }
 0x3c3   :  { %1455 = vmatprep.subr.bf16.mxu1 %v1842_v0 }
 0x3c6   :  { %1456 = vmatpush3.bf16.msra.mxu1 %v1570_v7 }
 0x3c7   :  { %1457 = vmatprep.subr.bf16.mxu1 %v1842_v0 }
 0x3ca   :  { %1458 = vmatpush3.bf16.msra.mxu1 %v1571_v8 }
 0x3cd   :  { %1460 = vmatmul.mubr.bf16.vlgmr.msra.gmra.mrb[12].mxu1 %v924_v1 }
 0x480   :  { %v1030_v9 = vpop.f32.mrb[8].mxu1 }
 0x481   :  { %v1441_v10 = vpop.f32.mrb[9].mxu1  ;;  %v1031_v15 = vadd.f32 %v1242_v13, %v1030_v9 }
 0x482   :  { %v1033_v11 = vpop.f32.mrb[10].mxu1 }
 0x483   :  { %v1442_v12 = vpop.f32.mrb[11].mxu1  ;;  %v1034_v20 = vadd.f32 %v1242_v13, %v1033_v11  ;;  %v1149_v22 = vmul.f32 %v1031_v15, %v2097_v14 }
 0x485   :  { %v1150_v26 = vmul.f32 %v1034_v20, %v2099_v16 }
 0x4a0   :  { %v1142_v21 = vpop.f32.mrb[12].mxu1 }
 0x4a1   :  { %v1143_v0 = vadd.f32 %v1251_v19, %v1142_v21  ;;  %v1461_v23 = vpop.f32.mrb[13].mxu1 }
 0x4a2   :  { %v1145_v25 = vpop.f32.mrb[14].mxu1 }
 0x4a3   :  { %v1151_v27 = vadd.f32 %v1149_v22, %v1143_v0  ;;  %v1146_v28 = vadd.f32 %v1251_v19, %v1145_v25  ;;  %v1462_v29 = vpop.f32.mrb[15].mxu1 }
 0x4a5   :  { %v1154_v30 = vmul.f32 %v1153_v24, %v1151_v27  ;;  %v1152_v31 = vadd.f32 %v1150_v26, %v1146_v28 }
 0x4a7   :  { %v1155_v32 = vmul.f32 %v1153_v24, %v1152_v31  ;;  %v1156_v17 = vadd.f32 %v1154_v30, %v2097_v14 }
 0x4a9   :  { %v1157_v18 = vadd.f32 %v1155_v32, %v2099_v16  ;;  %1158 = vst [vmem:[#allocation20] sm:$0xff] %v1156_v17 }
 0x4ab   :  { %1159 = vst [vmem:[#allocation20 + $0x8] sm:$0xff] %v1157_v18 }
 0x4ac   :  { %1803 = shalt.err (!%p1800_p0)
}
 0x4ad   :  { %s2227_s27 = sld [smem:[#allocation29_spill]] }
 0x4b3   :  { %s1804_s28 = scalar_lea.hbm %s2227_s27, 256 }
 0x4b4   :  { %p1805_p1 = scmp.ne.s32.totalorder %s2227_s27, %s1804_s28  ;;  %p1808_p2 = scmp.lt.u32.totalorder %s1804_s28, %s2227_s27 }
 0x4b6   :  { %p1810_p3 = pnand %p1808_p2, %p1805_p1 }
 0x4b8   :  { %1813 = shalt.err (!%p1810_p3)
}
 0x4b9   :  { %1171 = dma.vmem_to_hbm [thread:$0]  %s1166_s15, 256, %s2227_s27, [#allocation5], %s1829_s0, %s1829_s0, %s1830_s17  }
 0x4ba   :  { %1826 = dma.done.wait [#allocation5], 256  }
 0x4bb   :  { %1827 = vsyncadd [#allocation5], 4294967040 }
 0x4bc   :  { %1175 = vsyncpa [#allocation4], 1 }
 0x4bd   :  { %1176 = vsyncpa [#allocation7], 1 }
 0x4be   :  { %1177 = vsyncpa [#allocation10], 1 }
 0x4bf   :  { %1178 = vsyncpa [#allocation13], 1 }
 0x4c0   :  { %1179 = vsyncpa [#allocation16], 1 }
 0x4c1   :  { %1180 = vsyncpa [#allocation19], 1 }
 0x4c2   :  { %1181 = vsyncpa [#allocation5], 1 }

</bundles_post_ra>
